<compile_context>
chip_gen: v6e
topology: v6e:2x2x1
jax: 0.10.0
libtpu: 0.0.40
codegen_flags: <defaults>
</compile_context>

<pallas_src>
import functools

import jax
import jax.numpy as jnp
from jax.experimental import pallas as pl
from jax.experimental.pallas import tpu as pltpu


# --------------------------------------------------------------------------
# Pallas kernels (elementwise hot path)
# --------------------------------------------------------------------------
def _int_to_float_kernel(x_ref, o_ref, *, max_val):
    # integer image -> float image scaled into [0, 1] (true divide, computed
    # in f32 then cast to the output dtype).
    x = x_ref[...].astype(jnp.float32) / jnp.float32(max_val)
    o_ref[...] = x.astype(o_ref.dtype)


def _float_to_float_kernel(x_ref, o_ref):
    # plain dtype cast between float types (e.g. f32 -> bf16)
    o_ref[...] = x_ref[...].astype(o_ref.dtype)


# --------------------------------------------------------------------------
# Wrapper (glue: lane-dense 2D slab, row-block tiling, pallas_call)
# --------------------------------------------------------------------------
_LANES = 128
_BLOCK_ROWS = 8192            # (8192,128): 1 MiB u8 in + 4 MiB f32 out per block
_MIN_PALLAS_ELEMS = 1 << 20   # below this, XLA's fused elementwise wins


def convert_image_dtype(image: jax.Array, dtype=jnp.float32, *,
                        min_pallas_elems: int = _MIN_PALLAS_ELEMS) -> jax.Array:
    in_dtype = image.dtype
    dtype = jnp.dtype(dtype)

    # Fast path: nothing to do.
    if in_dtype == dtype:
        return image

    int_in = jnp.issubdtype(in_dtype, jnp.integer)
    float_in = jnp.issubdtype(in_dtype, jnp.floating)
    float_out = jnp.issubdtype(dtype, jnp.floating)

    if int_in and float_out:
        max_in = float(jnp.iinfo(in_dtype).max)
        kernel = functools.partial(_int_to_float_kernel, max_val=max_in)

        def fallback(x):
            return (x.astype(jnp.float32) / jnp.float32(max_in)).astype(dtype)
    elif float_in and float_out:
        kernel = _float_to_float_kernel

        def fallback(x):
            return x.astype(dtype)
    else:
        # TODO(synk): float->int and int->int rescaling paths of
        # convert_image_dtype (unused in detection pipelines).
        raise NotImplementedError(
            f"convert_image_dtype {in_dtype} -> {dtype} not implemented"
        )

    total = image.size

    # Plain-XLA fallback (one fused read + write, zero extra HBM passes) for:
    #  (a) tiny images where pallas_call launch/pipeline setup dominates,
    #  (b) element counts not divisible by 128, where a Pallas path would
    #      need a pad + slice (each a full extra HBM pass) to form the slab.
    if total < min_pallas_elems or total % _LANES != 0:
        return fallback(image)

    rows = total // _LANES
    x2d = image.reshape(rows, _LANES)        # zero-copy view of contiguous data

    # Row-block tiling.  8192-row blocks (~10 MiB double-buffered with f32
    # output) fit all generations' scoped-VMEM defaults.  If the image would
    # fit in a single block, split into >=2 blocks (32-row aligned = native
    # uint8 tile) so v7x's two TensorCores both get grid steps.
    block_rows = min(_BLOCK_ROWS, rows)
    if block_rows == rows and rows >= 64:
        block_rows = max(32, (rows // 2) // 32 * 32)
    grid = (pl.cdiv(rows, block_rows),)

    out2d = pl.pallas_call(
        kernel,
        out_shape=jax.ShapeDtypeStruct((rows, _LANES), dtype),
        grid=grid,
        in_specs=[pl.BlockSpec((block_rows, _LANES), lambda i: (i, 0))],
        out_specs=pl.BlockSpec((block_rows, _LANES), lambda i: (i, 0)),
        compiler_params=pltpu.CompilerParams(
            dimension_semantics=("parallel",),
            vmem_limit_bytes=32 << 20,
        ),
    )(x2d)

    return out2d.reshape(image.shape)


class ConvertImageDtype:
    """JAX/Pallas equivalent of torchvision's ConvertImageDtype transform."""

    def __init__(self, dtype=jnp.float32):
        self.dtype = dtype

    def __call__(self, image, target=None):
        image = convert_image_dtype(image, self.dtype)
        return image, target


# --------------------------------------------------------------------------
# Demo / self-check
# --------------------------------------------------------------------------
if __name__ == "__main__":
    root = jax.random.PRNGKey(0)
    k0, k1, k2 = jax.random.split(root, 3)

    # 1) Small NCHW uint8 image (batch=2, channels=4, spatial=16x16):
    #    goes through the tiny-image plain-JAX fallback of the transform.
    image = jax.random.randint(k0, (2, 4, 16, 16), 0, 256, dtype=jnp.int32).astype(
        jnp.uint8
    )
    transform = ConvertImageDtype(jnp.float32)
    out, target = transform(image, target=None)
    out = jax.block_until_ready(out)
    ref = image.astype(jnp.float32) / 255.0
    assert out.shape == image.shape and out.dtype == jnp.float32 and target is None
    assert bool(jnp.allclose(out, ref, atol=1e-6, rtol=1e-6))

    # 2) Medium 128-aligned image forced through the Pallas kernel path
    #    (rows=3840 -> split into two 1920-row blocks, grid=(2,)).
    med = jax.random.randint(k1, (3, 320, 512), 0, 256, dtype=jnp.int32).astype(
        jnp.uint8
    )
    out_med = jax.block_until_ready(
        convert_image_dtype(med, jnp.float32, min_pallas_elems=0)
    )
    ref_med = med.astype(jnp.float32) / 255.0
    assert out_med.shape == med.shape and out_med.dtype == jnp.float32
    assert bool(jnp.allclose(out_med, ref_med, atol=1e-6, rtol=1e-6))

    # 3) float32 -> bfloat16 cast path through the Pallas kernel.
    fmed = ref_med  # f32 image in [0, 1]
    out_bf16 = jax.block_until_ready(
        convert_image_dtype(fmed, jnp.bfloat16, min_pallas_elems=0)
    )
    ref_bf16 = fmed.astype(jnp.bfloat16)
    assert out_bf16.dtype == jnp.bfloat16
    assert bool(
        jnp.allclose(
            out_bf16.astype(jnp.float32), ref_bf16.astype(jnp.float32), atol=0, rtol=0
        )
    )

    # 4) Non-128-divisible element count exercises the misaligned fallback.
    odd = jax.random.randint(k2, (3, 17, 19), 0, 256, dtype=jnp.int32).astype(
        jnp.uint8
    )
    out_odd = jax.block_until_ready(convert_image_dtype(odd, jnp.float32))
    ref_odd = odd.astype(jnp.float32) / 255.0
    assert out_odd.shape == odd.shape
    assert bool(jnp.allclose(out_odd, ref_odd, atol=1e-6, rtol=1e-6))

    # 5) Identity fast path: no kernel, same array semantics.
    same, _ = ConvertImageDtype(jnp.uint8)(image)
    assert same.dtype == jnp.uint8
    assert bool(jnp.all(same == image))

    print("KERNEL_OK")
</pallas_src>

<mosaic_0001>
module attributes {stable_mosaic.version = 11 : i64} {
  func.func @_int_to_float_kernel(%arg0: i32, %arg1: memref<1920x128xi8, #tpu.memory_space<vmem>>, %arg2: memref<1920x128xf32, #tpu.memory_space<vmem>>) attributes {dimension_semantics = [#tpu.dimension_semantics<parallel>], iteration_bounds = array<i64: 2>, scalar_prefetch = 0 : i64, scratch_operands = 0 : i64, tpu.core_type = #tpu.core_type<tc>, window_params = [{transform_indices = @transform_0, window_bounds = array<i64: 1920, 128>}, {transform_indices = @transform_1, window_bounds = array<i64: 1920, 128>}]} {
    %c0 = arith.constant 0 : index
    %c0_0 = arith.constant 0 : index
    %0 = vector.load %arg1[%c0, %c0_0] : memref<1920x128xi8, #tpu.memory_space<vmem>>, vector<1920x128xi8>
    %1 = arith.uitofp %0 : vector<1920x128xi8> to vector<1920x128xf32>
    %cst = arith.constant 2.550000e+02 : f32
    %2 = vector.broadcast %cst : f32 to vector<1920x128xf32>
    %3 = arith.divf %1, %2 : vector<1920x128xf32>
    %c0_1 = arith.constant 0 : index
    %c0_2 = arith.constant 0 : index
    %4 = vector.load %arg2[%c0_1, %c0_2] : memref<1920x128xf32, #tpu.memory_space<vmem>>, vector<1920x128xf32>
    tpu.vector_store %arg2[%c0_1, %c0_2], %3 {strides = array<i32>} : memref<1920x128xf32, #tpu.memory_space<vmem>>, vector<1920x128xf32>,
    return
  }
  func.func @transform_0(%arg0: i32) -> (i32, i32) {
    %c0_i32 = arith.constant 0 : i32
    %c0_i32_0 = arith.constant 0 : i32
    return %arg0, %c0_i32 : i32, i32
  }
  func.func @transform_1(%arg0: i32) -> (i32, i32) {
    %c0_i32 = arith.constant 0 : i32
    %c0_i32_0 = arith.constant 0 : i32
    return %arg0, %c0_i32 : i32, i32
  }
}

</mosaic_0001>

<bundles_post_ra>
// kernel: tpu_custom_call.1
= control target key start
LH: loop header
LB: loop body
LE: loop exit
PB: predicated region body
PF: predicated region fallthrough
CT: control target
= control target key end

     0   :  { %6 = vsyncpa [#allocation3], 0  ;;  %s2114_s0 = inlined_call_operand.hbm [shape: u8[3840,128], index: 0, kind: input, shape index: {}]   ;;  %s2115_s1 = inlined_call_operand.hbm [shape: f32[3840,128], index: 1, kind: output, shape index: {}]  }
   0x1   :  { %8 = vsyncpa [#allocation3 + $0x1], 0 }
   0x2   :  { %9 = vsyncpa [#allocation4], 0 }
   0x3   :  { %11 = vsyncpa [#allocation4 + $0x1], 0  ;;  %s1658_s6 = smov 0   ;;  %s1660_s7 = smov 0  }
   0x4   :  { %s1662_s8 = smov 0   ;;  %s1664_s9 = smov 0  }
   0x5 LB: > { %s1679_s10 = sadd.s32 4294967295, %s1640_s9   ;;  %s1485_s11 = sadd.s32 4294967294, %s1640_s9   ;;  %s1640_s9 = sphi %s1664_s9, %s2129_s9   ;;  %s1636_s8 = sphi %s1662_s8, %s2128_s8   ;;  %s1632_s7 = sphi %s1660_s7, %s2127_s7   ;;  %s1628_s6 = sphi %s1658_s6, %s2126_s6  }
   0x6   : > { %s1683_s12 = sadd.s32 1, %s1640_s9   ;;  %s24_s13 = sadd.s32 1, %s1636_s8 }
   0x7   : > { %s21_s14 = ssub.s32 %s1640_s9, %s1683_s12  ;;  %p31_p0 = scmp.ne.s32.totalorder %s1636_s8, %s1632_s7 }
   0x8   : > { %p22_p1 = scmp.eq.s32.totalorder %s21_s14, 0  ;;  %p32_p2 = scmp.eq.s32.totalorder %s1640_s9, 0 }
   0x9   : > { %p37_p3 = scmp.ne.s32.totalorder %s1632_s7, %s1628_s6  ;;  %p38_p4 = scmp.eq.s32.totalorder %s1679_s10, 0 }
   0xa   : > { %s1695_s15 = scalar_select %p22_p1, %s1636_s8, %s24_s13  }
   0xb   : > { %p33_p5 = por %p32_p2, %p31_p0  ;;  %p1697_p6 = por %p38_p4, %p37_p3 }
   0xc   : > { %p61_p7 = scmp.eq.s32.totalorder %s1679_s10, 1  ;;  %p67_p8 = scmp.eq.s32.totalorder %s1485_s11, 1 }
   0xd   : > { %s2118_s16 = scalar_select %p1697_p6, 1, 0 }
   0xe   : > { %p1510_p10 = scmp.lt.s32.totalorder %s1640_s9, 2  ;;  %p1704_p11 = por %p61_p7, %p31_p0 }
   0xf   : > { %p1708_p12 = por %p67_p8, %p37_p3  ;;  %s87_s19 = sand.u32 1, %s1636_s8  }
  0x10   : > { %s2119_s17 = scalar_select %p1704_p11, 1, 0 }
  0x11   : > { %s2120_s18 = scalar_select %p1708_p12, 1, 0 }
  0x12   : > { %s1493_s20 = smul.u32 7680, %s1640_s9  ;;  %p1719_p13 = pnand %p1510_p10, %p33_p5 }
  0x13   : > { %s1495_s21 = smul.u32 480, %s87_s19  ;;  %s1725_s28 = scalar_lea.sflag [#allocation3], %s87_s19 }
  0x14   : > { %s1717_s24 = scalar_lea.hbm %s2114_s0, %s1493_s20  ;;  %p1550_p1 = pneg %p1719_p13 }
  0x15   : > { %s91_s26 = scalar_lea.vmem [#allocation2], %s1495_s21  ;;  %s1548_s29 = scalar_lea.hbm %s1717_s24, 7680 }
  0x16   : > { %s98_s27 = sshll.u32 %s91_s26, 4  ;;  %p1549_p0 = scmp.ne.s32.totalorder %s1717_s24, %s1548_s29  ;;  %s1723_s27 = int_to_ptr.vmem [resolvable:$true] %s98_s27 }
  0x17   : > { %s1553_s3 = scalar_lea.hbm %s2114_s0, 15360  ;;  %p1554_p4 = scmp.lt.s32.totalorder %s1717_s24, %s2114_s0 }
  0x18   : > { %p1551_p2 = pnand %p1550_p1, %p1549_p0  ;;  %p1555_p5 = scmp.lt.s32.totalorder %s1553_s3, %s1548_s29 }
  0x1a   : > { %p1552_p3 = pneg %p1551_p2  ;;  %p1556_p7 = por %p1555_p5, %p1554_p4 }
  0x1c   : > { %p1557_p8 = pnand %p1556_p7, %p1552_p3 }
  0x1e   : > { %1560 = shalt.err (!%p1557_p8)
}
  0x1f   : > { %s1561_s11 = scalar_lea.vmem %s1723_s27, 7680  ;;  %s1642_s13 = smov [#allocation2]  }
  0x20   : > { %p1562_p10 = scmp.ne.s32.totalorder %s1723_s27, %s1561_s11  ;;  %s1566_s14 = sshll.u32 %s1642_s13, 4  ;;  %s1567_s14 = int_to_ptr.vmem [resolvable:$false] %s1566_s14 }
  0x21   : > { %s1568_s19 = scalar_lea.vmem %s1567_s14, 15360  ;;  %p1569_p2 = scmp.lt.s32.totalorder %s1723_s27, %s1567_s14 }
  0x22   : > { %p1564_p9 = pnand %p1562_p10, %p1550_p1  ;;  %p1570_p12 = scmp.lt.s32.totalorder %s1568_s19, %s1561_s11 }
  0x24   : > { %p1565_p0 = pneg %p1564_p9  ;;  %p1571_p11 = por %p1570_p12, %p1569_p2 }
  0x26   : > { %p1572_p6 = pnand %p1571_p11, %p1565_p0 }
  0x28   : > { %1575 = shalt.err (!%p1572_p6)
}
  0x29   : > { %s1643_s20 = smov 128   ;;  %s1644_s21 = smov 8  }
  0x2a   : > { %1505 = dma.hbm_to_vmem [thread:$0]  (!%p1719_p13), %s1717_s24, 7680, %s1723_s27, %s1725_s28, %s1643_s20, %s1643_s20, %s1644_s21  }
  0x2b   : > { %p1489_p9 = scmp.ge.s32.totalorder %s1640_s9, 1  ;;  %p106_p1 = scmp.lt.s32.totalorder %s1640_s9, 3 }
  0x2d   : > { %p107_p3 = pnand %p1489_p9, %p106_p1 }
  0x2e   : > { %s1749_s22 = sand.u32 (!%p107_p3), 1, %s1632_s7   ;;  %p2122_p6 = scmp.ne.s32.totalorder (!%p107_p3), %s2118_s16, 0 }
  0x2f   : > { %110 = sbr.rel (%p107_p3) target bundleno = 311 (0x137), region = 24  ;;  %s113_s26 = scalar_lea.sflag (!%p107_p3), [#allocation3], %s1749_s22 }
  0x30   : > { %s1496_s23 = smul.u32 (!%p107_p3), 480, %s1749_s22 }
  0x32   : > { %s1753_s29 = scalar_lea.vmem (!%p107_p3), [#allocation2], %s1496_s23 }
  0x34   : > { %1619 = dma.done.wait (%p2122_p6), %s113_s26, 7680  }
  0x35   : > { %1621 = vsyncadd (%p2122_p6), %s113_s26, 4294959616  ;;  %v137_v0 = vld [vmem:[%s1753_s29] sm:$0xff]  ;;  %v138_v1 = vld [vmem:[%s1753_s29 + $0x8] sm:$0xff]  ;;  %s1497_s24 = smul.u32 1920, %s1749_s22  ;;  %s1399_s2 = scalar_lea.sflag [#allocation4], %s1749_s22 }
  0x36   : > { %v197_v2 = vunpack.c.0.s8 %v137_v0  ;;  %v198_v3 = vunpack.c.1.s8 %v137_v0  ;;  %v199_v4 = vunpack.c.2.s8 %v137_v0  ;;  %v200_v5 = vunpack.c.3.s8 %v137_v0  ;;  %v139_v18 = vld [vmem:[%s1753_s29 + $0x10] sm:$0xff]  ;;  %v140_v27 = vld [vmem:[%s1753_s29 + $0x18] sm:$0xff]  ;;  %v141_v52 = vld [vmem:[%s1753_s29 + $0x20] sm:$0xff]  ;;  %s1494_s25 = smul.u32 30720, %s1679_s10  ;;  %p2123_p12 = scmp.ne.s32.totalorder %s2119_s17, 0 }
  0x37   : > { %v201_v6 = vunpack.c.0.s8 %v138_v1  ;;  %v202_v7 = vunpack.c.1.s8 %v138_v1  ;;  %v203_v8 = vunpack.c.2.s8 %v138_v1  ;;  %v204_v9 = vunpack.c.3.s8 %v138_v1  ;;  %s1766_s16 = scalar_lea.vmem [#allocation5], %s1497_s24  ;;  %v142_v1 = vld [vmem:[%s1753_s29 + $0x28] sm:$0xff]  ;;  %s1645_s4 = smov [#allocation5]  }
  0x38   : > { %v437_v10 = vand.u32 255, %v197_v2  ;;  %v438_v11 = vand.u32 255, %v198_v3  ;;  %v439_v12 = vand.u32 255, %v199_v4  ;;  %v440_v13 = vand.u32 255, %v200_v5  ;;  %s1412_s27 = sshll.u32 %s1766_s16, 4  ;;  %s2063_s30 = scalar_lea.hbm %s2115_s1, %s1494_s25  ;;  %s2065_s27 = int_to_ptr.vmem [resolvable:$true] %s1412_s27 }
  0x39   : > { %v441_v14 = vand.u32 255, %v201_v6  ;;  %v442_v15 = vand.u32 255, %v202_v7  ;;  %v443_v16 = vand.u32 255, %v203_v8  ;;  %v444_v17 = vand.u32 255, %v204_v9  ;;  %s1576_s3 = scalar_lea.vmem %s2065_s27, 30720  ;;  %s1580_s5 = sshll.u32 %s1645_s4, 4  ;;  %s1581_s5 = int_to_ptr.vmem [resolvable:$false] %s1580_s5 }
  0x3a   : > { %v677_v19 = vcvt.s32.f32 %v437_v10  ;;  %v678_v20 = vcvt.s32.f32 %v438_v11  ;;  %v679_v21 = vcvt.s32.f32 %v439_v12  ;;  %v680_v22 = vcvt.s32.f32 %v440_v13  ;;  %p1577_p11 = scmp.ne.s32.totalorder %s2065_s27, %s1576_s3  ;;  %s1582_s11 = scalar_lea.vmem %s1581_s5, 61440 }
  0x3b   : > { %v681_v23 = vcvt.s32.f32 %v441_v14  ;;  %v682_v24 = vcvt.s32.f32 %v442_v15  ;;  %v683_v25 = vcvt.s32.f32 %v443_v16  ;;  %v684_v26 = vcvt.s32.f32 %v444_v17  ;;  %p1583_p5 = scmp.lt.s32.totalorder %s2065_s27, %s1581_s5  ;;  %p1584_p7 = scmp.lt.s32.totalorder %s1582_s11, %s1576_s3 }
  0x3c   : > { %v918_v28 = vmul.f32 0.003921569, %v677_v19  ;;  %v919_v29 = vmul.f32 0.003921569, %v678_v20  ;;  %v920_v30 = vmul.f32 0.003921569, %v679_v21  ;;  %v205_v31 = vunpack.c.0.s8 %v139_v18  ;;  %p1578_p13 = pnand %p1577_p11, %p2123_p12 }
  0x3d   : > { %v921_v32 = vmul.f32 0.003921569, %v680_v22  ;;  %v922_v33 = vmul.f32 0.003921569, %v681_v23  ;;  %v923_v34 = vmul.f32 0.003921569, %v682_v24  ;;  %v206_v35 = vunpack.c.1.s8 %v139_v18  ;;  %p1585_p8 = por %p1584_p7, %p1583_p5 }
  0x3e   : > { %1158 = vst [vmem:[%s1766_s16] sm:$0xff] %v918_v28  ;;  %1159 = vst [vmem:[%s1766_s16 + $0x8] sm:$0xff] %v919_v29  ;;  %v924_v36 = vmul.f32 0.003921569, %v683_v25  ;;  %v925_v37 = vmul.f32 0.003921569, %v684_v26  ;;  %v445_v38 = vand.u32 255, %v205_v31  ;;  %v207_v39 = vunpack.c.2.s8 %v139_v18  ;;  %p1579_p4 = pneg %p1578_p13 }
  0x3f   : > { %1160 = vst [vmem:[%s1766_s16 + $0x10] sm:$0xff] %v920_v30  ;;  %1161 = vst [vmem:[%s1766_s16 + $0x18] sm:$0xff] %v921_v32  ;;  %v446_v40 = vand.u32 255, %v206_v35  ;;  %v208_v41 = vunpack.c.3.s8 %v139_v18  ;;  %v209_v42 = vunpack.c.0.s8 %v140_v27  ;;  %v210_v43 = vunpack.c.1.s8 %v140_v27  ;;  %v143_v22 = vld [vmem:[%s1753_s29 + $0x30] sm:$0xff]  ;;  %v144_v35 = vld [vmem:[%s1753_s29 + $0x38] sm:$0xff] }
  0x40   : > { %1162 = vst [vmem:[%s1766_s16 + $0x20] sm:$0xff] %v922_v33  ;;  %1163 = vst [vmem:[%s1766_s16 + $0x28] sm:$0xff] %v923_v34  ;;  %v685_v44 = vcvt.s32.f32 %v445_v38  ;;  %v447_v45 = vand.u32 255, %v207_v39  ;;  %v211_v46 = vunpack.c.2.s8 %v140_v27  ;;  %v212_v47 = vunpack.c.3.s8 %v140_v27  ;;  %p1586_p10 = pnand %p1585_p8, %p1579_p4 }
  0x41   : > { %1164 = vst [vmem:[%s1766_s16 + $0x30] sm:$0xff] %v924_v36  ;;  %1165 = vst [vmem:[%s1766_s16 + $0x38] sm:$0xff] %v925_v37  ;;  %v686_v48 = vcvt.s32.f32 %v446_v40  ;;  %v448_v49 = vand.u32 255, %v208_v41  ;;  %v449_v50 = vand.u32 255, %v209_v42  ;;  %v450_v51 = vand.u32 255, %v210_v43 }
  0x42   : > { %v926_v53 = vmul.f32 0.003921569, %v685_v44  ;;  %v687_v54 = vcvt.s32.f32 %v447_v45  ;;  %v451_v55 = vand.u32 255, %v211_v46  ;;  %v452_v56 = vand.u32 255, %v212_v47 }
  0x43   : > { %v927_v57 = vmul.f32 0.003921569, %v686_v48  ;;  %v688_v58 = vcvt.s32.f32 %v448_v49  ;;  %v689_v59 = vcvt.s32.f32 %v449_v50  ;;  %v690_v60 = vcvt.s32.f32 %v450_v51 }
  0x44   : > { %1166 = vst [vmem:[%s1766_s16 + $0x40] sm:$0xff] %v926_v53  ;;  %v928_v61 = vmul.f32 0.003921569, %v687_v54  ;;  %v691_v62 = vcvt.s32.f32 %v451_v55  ;;  %v692_v63 = vcvt.s32.f32 %v452_v56  ;;  %v213_v0 = vunpack.c.0.s8 %v141_v52  ;;  %v145_v56 = vld [vmem:[%s1753_s29 + $0x40] sm:$0xff] }
  0x45   : > { %1167 = vst [vmem:[%s1766_s16 + $0x48] sm:$0xff] %v927_v57  ;;  %v929_v2 = vmul.f32 0.003921569, %v688_v58  ;;  %v930_v3 = vmul.f32 0.003921569, %v689_v59  ;;  %v214_v5 = vunpack.c.1.s8 %v141_v52  ;;  %v215_v9 = vunpack.c.2.s8 %v141_v52 }
  0x46   : > { %v931_v4 = vmul.f32 0.003921569, %v690_v60  ;;  %1168 = vst [vmem:[%s1766_s16 + $0x50] sm:$0xff] %v928_v61  ;;  %v932_v6 = vmul.f32 0.003921569, %v691_v62  ;;  %v453_v8 = vand.u32 255, %v213_v0  ;;  %v216_v11 = vunpack.c.3.s8 %v141_v52 }
  0x47   : > { %v933_v7 = vmul.f32 0.003921569, %v692_v63  ;;  %1169 = vst [vmem:[%s1766_s16 + $0x58] sm:$0xff] %v929_v2  ;;  %1170 = vst [vmem:[%s1766_s16 + $0x60] sm:$0xff] %v930_v3  ;;  %v454_v10 = vand.u32 255, %v214_v5  ;;  %v217_v12 = vunpack.c.0.s8 %v142_v1  ;;  %v218_v13 = vunpack.c.1.s8 %v142_v1  ;;  %v146_v5 = vld [vmem:[%s1753_s29 + $0x48] sm:$0xff] }
  0x48   : > { %1171 = vst [vmem:[%s1766_s16 + $0x68] sm:$0xff] %v931_v4  ;;  %1172 = vst [vmem:[%s1766_s16 + $0x70] sm:$0xff] %v932_v6  ;;  %v693_v14 = vcvt.s32.f32 %v453_v8  ;;  %v455_v15 = vand.u32 255, %v215_v9  ;;  %v219_v16 = vunpack.c.2.s8 %v142_v1  ;;  %v220_v17 = vunpack.c.3.s8 %v142_v1 }
  0x49   : > { %1173 = vst [vmem:[%s1766_s16 + $0x78] sm:$0xff] %v933_v7  ;;  %v694_v18 = vcvt.s32.f32 %v454_v10  ;;  %v456_v19 = vand.u32 255, %v216_v11  ;;  %v457_v20 = vand.u32 255, %v217_v12  ;;  %v458_v21 = vand.u32 255, %v218_v13 }
  0x4a   : > { %v934_v23 = vmul.f32 0.003921569, %v693_v14  ;;  %v695_v24 = vcvt.s32.f32 %v455_v15  ;;  %v459_v25 = vand.u32 255, %v219_v16  ;;  %v460_v26 = vand.u32 255, %v220_v17 }
  0x4b   : > { %v935_v27 = vmul.f32 0.003921569, %v694_v18  ;;  %v696_v28 = vcvt.s32.f32 %v456_v19  ;;  %v697_v29 = vcvt.s32.f32 %v457_v20  ;;  %v698_v30 = vcvt.s32.f32 %v458_v21 }
  0x4c   : > { %1174 = vst [vmem:[%s1766_s16 + $0x80] sm:$0xff] %v934_v23  ;;  %v936_v31 = vmul.f32 0.003921569, %v695_v24  ;;  %v699_v32 = vcvt.s32.f32 %v459_v25  ;;  %v700_v33 = vcvt.s32.f32 %v460_v26  ;;  %v221_v34 = vunpack.c.0.s8 %v143_v22  ;;  %v147_v26 = vld [vmem:[%s1753_s29 + $0x50] sm:$0xff] }
  0x4d   : > { %1175 = vst [vmem:[%s1766_s16 + $0x88] sm:$0xff] %v935_v27  ;;  %v937_v36 = vmul.f32 0.003921569, %v696_v28  ;;  %v938_v37 = vmul.f32 0.003921569, %v697_v29  ;;  %v222_v39 = vunpack.c.1.s8 %v143_v22  ;;  %v223_v43 = vunpack.c.2.s8 %v143_v22 }
  0x4e   : > { %v939_v38 = vmul.f32 0.003921569, %v698_v30  ;;  %1176 = vst [vmem:[%s1766_s16 + $0x90] sm:$0xff] %v936_v31  ;;  %v940_v40 = vmul.f32 0.003921569, %v699_v32  ;;  %v461_v42 = vand.u32 255, %v221_v34  ;;  %v224_v45 = vunpack.c.3.s8 %v143_v22 }
  0x4f   : > { %v941_v41 = vmul.f32 0.003921569, %v700_v33  ;;  %1177 = vst [vmem:[%s1766_s16 + $0x98] sm:$0xff] %v937_v36  ;;  %1178 = vst [vmem:[%s1766_s16 + $0xa0] sm:$0xff] %v938_v37  ;;  %v462_v44 = vand.u32 255, %v222_v39  ;;  %v225_v46 = vunpack.c.0.s8 %v144_v35  ;;  %v226_v47 = vunpack.c.1.s8 %v144_v35  ;;  %v148_v39 = vld [vmem:[%s1753_s29 + $0x58] sm:$0xff] }
  0x50   : > { %1179 = vst [vmem:[%s1766_s16 + $0xa8] sm:$0xff] %v939_v38  ;;  %1180 = vst [vmem:[%s1766_s16 + $0xb0] sm:$0xff] %v940_v40  ;;  %v701_v48 = vcvt.s32.f32 %v461_v42  ;;  %v463_v49 = vand.u32 255, %v223_v43  ;;  %v227_v50 = vunpack.c.2.s8 %v144_v35  ;;  %v228_v51 = vunpack.c.3.s8 %v144_v35 }
  0x51   : > { %1181 = vst [vmem:[%s1766_s16 + $0xb8] sm:$0xff] %v941_v41  ;;  %v702_v52 = vcvt.s32.f32 %v462_v44  ;;  %v464_v53 = vand.u32 255, %v224_v45  ;;  %v465_v54 = vand.u32 255, %v225_v46  ;;  %v466_v55 = vand.u32 255, %v226_v47 }
  0x52   : > { %v942_v57 = vmul.f32 0.003921569, %v701_v48  ;;  %v703_v58 = vcvt.s32.f32 %v463_v49  ;;  %v467_v59 = vand.u32 255, %v227_v50  ;;  %v468_v60 = vand.u32 255, %v228_v51 }
  0x53   : > { %v943_v61 = vmul.f32 0.003921569, %v702_v52  ;;  %v704_v62 = vcvt.s32.f32 %v464_v53  ;;  %v705_v63 = vcvt.s32.f32 %v465_v54  ;;  %v706_v0 = vcvt.s32.f32 %v466_v55 }
  0x54   : > { %1182 = vst [vmem:[%s1766_s16 + $0xc0] sm:$0xff] %v942_v57  ;;  %v944_v1 = vmul.f32 0.003921569, %v703_v58  ;;  %v707_v2 = vcvt.s32.f32 %v467_v59  ;;  %v708_v3 = vcvt.s32.f32 %v468_v60  ;;  %v229_v4 = vunpack.c.0.s8 %v145_v56  ;;  %v149_v60 = vld [vmem:[%s1753_s29 + $0x60] sm:$0xff] }
  0x55   : > { %1183 = vst [vmem:[%s1766_s16 + $0xc8] sm:$0xff] %v943_v61  ;;  %v945_v6 = vmul.f32 0.003921569, %v704_v62  ;;  %v946_v7 = vmul.f32 0.003921569, %v705_v63  ;;  %v230_v9 = vunpack.c.1.s8 %v145_v56  ;;  %v231_v13 = vunpack.c.2.s8 %v145_v56 }
  0x56   : > { %v947_v8 = vmul.f32 0.003921569, %v706_v0  ;;  %1184 = vst [vmem:[%s1766_s16 + $0xd0] sm:$0xff] %v944_v1  ;;  %v948_v10 = vmul.f32 0.003921569, %v707_v2  ;;  %v469_v12 = vand.u32 255, %v229_v4  ;;  %v232_v15 = vunpack.c.3.s8 %v145_v56 }
  0x57   : > { %v949_v11 = vmul.f32 0.003921569, %v708_v3  ;;  %1185 = vst [vmem:[%s1766_s16 + $0xd8] sm:$0xff] %v945_v6  ;;  %1186 = vst [vmem:[%s1766_s16 + $0xe0] sm:$0xff] %v946_v7  ;;  %v470_v14 = vand.u32 255, %v230_v9  ;;  %v233_v16 = vunpack.c.0.s8 %v146_v5  ;;  %v234_v17 = vunpack.c.1.s8 %v146_v5  ;;  %v150_v9 = vld [vmem:[%s1753_s29 + $0x68] sm:$0xff] }
  0x58   : > { %1187 = vst [vmem:[%s1766_s16 + $0xe8] sm:$0xff] %v947_v8  ;;  %1188 = vst [vmem:[%s1766_s16 + $0xf0] sm:$0xff] %v948_v10  ;;  %v709_v18 = vcvt.s32.f32 %v469_v12  ;;  %v471_v19 = vand.u32 255, %v231_v13  ;;  %v235_v20 = vunpack.c.2.s8 %v146_v5  ;;  %v236_v21 = vunpack.c.3.s8 %v146_v5 }
  0x59   : > { %1189 = vst [vmem:[%s1766_s16 + $0xf8] sm:$0xff] %v949_v11  ;;  %v710_v22 = vcvt.s32.f32 %v470_v14  ;;  %v472_v23 = vand.u32 255, %v232_v15  ;;  %v473_v24 = vand.u32 255, %v233_v16  ;;  %v474_v25 = vand.u32 255, %v234_v17 }
  0x5a   : > { %v950_v27 = vmul.f32 0.003921569, %v709_v18  ;;  %v711_v28 = vcvt.s32.f32 %v471_v19  ;;  %v475_v29 = vand.u32 255, %v235_v20  ;;  %v476_v30 = vand.u32 255, %v236_v21 }
  0x5b   : > { %v951_v31 = vmul.f32 0.003921569, %v710_v22  ;;  %v712_v32 = vcvt.s32.f32 %v472_v23  ;;  %v713_v33 = vcvt.s32.f32 %v473_v24  ;;  %v714_v34 = vcvt.s32.f32 %v474_v25 }
  0x5c   : > { %1190 = vst [vmem:[%s1766_s16 + $0x100] sm:$0xff] %v950_v27  ;;  %v952_v35 = vmul.f32 0.003921569, %v711_v28  ;;  %v715_v36 = vcvt.s32.f32 %v475_v29  ;;  %v716_v37 = vcvt.s32.f32 %v476_v30  ;;  %v237_v38 = vunpack.c.0.s8 %v147_v26  ;;  %v151_v30 = vld [vmem:[%s1753_s29 + $0x70] sm:$0xff] }
  0x5d   : > { %1191 = vst [vmem:[%s1766_s16 + $0x108] sm:$0xff] %v951_v31  ;;  %v953_v40 = vmul.f32 0.003921569, %v712_v32  ;;  %v954_v41 = vmul.f32 0.003921569, %v713_v33  ;;  %v238_v43 = vunpack.c.1.s8 %v147_v26  ;;  %v239_v47 = vunpack.c.2.s8 %v147_v26 }
  0x5e   : > { %v955_v42 = vmul.f32 0.003921569, %v714_v34  ;;  %1192 = vst [vmem:[%s1766_s16 + $0x110] sm:$0xff] %v952_v35  ;;  %v956_v44 = vmul.f32 0.003921569, %v715_v36  ;;  %v477_v46 = vand.u32 255, %v237_v38  ;;  %v240_v49 = vunpack.c.3.s8 %v147_v26 }
  0x5f   : > { %v957_v45 = vmul.f32 0.003921569, %v716_v37  ;;  %1193 = vst [vmem:[%s1766_s16 + $0x118] sm:$0xff] %v953_v40  ;;  %1194 = vst [vmem:[%s1766_s16 + $0x120] sm:$0xff] %v954_v41  ;;  %v478_v48 = vand.u32 255, %v238_v43  ;;  %v241_v50 = vunpack.c.0.s8 %v148_v39  ;;  %v242_v51 = vunpack.c.1.s8 %v148_v39  ;;  %v152_v43 = vld [vmem:[%s1753_s29 + $0x78] sm:$0xff] }
  0x60   : > { %1195 = vst [vmem:[%s1766_s16 + $0x128] sm:$0xff] %v955_v42  ;;  %1196 = vst [vmem:[%s1766_s16 + $0x130] sm:$0xff] %v956_v44  ;;  %v717_v52 = vcvt.s32.f32 %v477_v46  ;;  %v479_v53 = vand.u32 255, %v239_v47  ;;  %v243_v54 = vunpack.c.2.s8 %v148_v39  ;;  %v244_v55 = vunpack.c.3.s8 %v148_v39 }
  0x61   : > { %1197 = vst [vmem:[%s1766_s16 + $0x138] sm:$0xff] %v957_v45  ;;  %v718_v56 = vcvt.s32.f32 %v478_v48  ;;  %v480_v57 = vand.u32 255, %v240_v49  ;;  %v481_v58 = vand.u32 255, %v241_v50  ;;  %v482_v59 = vand.u32 255, %v242_v51 }
  0x62   : > { %v958_v61 = vmul.f32 0.003921569, %v717_v52  ;;  %v719_v62 = vcvt.s32.f32 %v479_v53  ;;  %v483_v63 = vand.u32 255, %v243_v54  ;;  %v484_v0 = vand.u32 255, %v244_v55 }
  0x63   : > { %v959_v1 = vmul.f32 0.003921569, %v718_v56  ;;  %v720_v2 = vcvt.s32.f32 %v480_v57  ;;  %v721_v3 = vcvt.s32.f32 %v481_v58  ;;  %v722_v4 = vcvt.s32.f32 %v482_v59 }
  0x64   : > { %1198 = vst [vmem:[%s1766_s16 + $0x140] sm:$0xff] %v958_v61  ;;  %v960_v5 = vmul.f32 0.003921569, %v719_v62  ;;  %v723_v6 = vcvt.s32.f32 %v483_v63  ;;  %v724_v7 = vcvt.s32.f32 %v484_v0  ;;  %v245_v8 = vunpack.c.0.s8 %v149_v60  ;;  %v153_v0 = vld [vmem:[%s1753_s29 + $0x80] sm:$0xff] }
  0x65   : > { %1199 = vst [vmem:[%s1766_s16 + $0x148] sm:$0xff] %v959_v1  ;;  %v961_v10 = vmul.f32 0.003921569, %v720_v2  ;;  %v962_v11 = vmul.f32 0.003921569, %v721_v3  ;;  %v246_v13 = vunpack.c.1.s8 %v149_v60  ;;  %v247_v17 = vunpack.c.2.s8 %v149_v60 }
  0x66   : > { %v963_v12 = vmul.f32 0.003921569, %v722_v4  ;;  %1200 = vst [vmem:[%s1766_s16 + $0x150] sm:$0xff] %v960_v5  ;;  %v964_v14 = vmul.f32 0.003921569, %v723_v6  ;;  %v485_v16 = vand.u32 255, %v245_v8  ;;  %v248_v19 = vunpack.c.3.s8 %v149_v60 }
  0x67   : > { %v965_v15 = vmul.f32 0.003921569, %v724_v7  ;;  %1201 = vst [vmem:[%s1766_s16 + $0x158] sm:$0xff] %v961_v10  ;;  %1202 = vst [vmem:[%s1766_s16 + $0x160] sm:$0xff] %v962_v11  ;;  %v486_v18 = vand.u32 255, %v246_v13  ;;  %v249_v20 = vunpack.c.0.s8 %v150_v9  ;;  %v250_v21 = vunpack.c.1.s8 %v150_v9  ;;  %v154_v13 = vld [vmem:[%s1753_s29 + $0x88] sm:$0xff] }
  0x68   : > { %1203 = vst [vmem:[%s1766_s16 + $0x168] sm:$0xff] %v963_v12  ;;  %1204 = vst [vmem:[%s1766_s16 + $0x170] sm:$0xff] %v964_v14  ;;  %v725_v22 = vcvt.s32.f32 %v485_v16  ;;  %v487_v23 = vand.u32 255, %v247_v17  ;;  %v251_v24 = vunpack.c.2.s8 %v150_v9  ;;  %v252_v25 = vunpack.c.3.s8 %v150_v9 }
  0x69   : > { %1205 = vst [vmem:[%s1766_s16 + $0x178] sm:$0xff] %v965_v15  ;;  %v726_v26 = vcvt.s32.f32 %v486_v18  ;;  %v488_v27 = vand.u32 255, %v248_v19  ;;  %v489_v28 = vand.u32 255, %v249_v20  ;;  %v490_v29 = vand.u32 255, %v250_v21 }
  0x6a   : > { %v966_v31 = vmul.f32 0.003921569, %v725_v22  ;;  %v727_v32 = vcvt.s32.f32 %v487_v23  ;;  %v491_v33 = vand.u32 255, %v251_v24  ;;  %v492_v34 = vand.u32 255, %v252_v25 }
  0x6b   : > { %v967_v35 = vmul.f32 0.003921569, %v726_v26  ;;  %v728_v36 = vcvt.s32.f32 %v488_v27  ;;  %v729_v37 = vcvt.s32.f32 %v489_v28  ;;  %v730_v38 = vcvt.s32.f32 %v490_v29 }
  0x6c   : > { %1206 = vst [vmem:[%s1766_s16 + $0x180] sm:$0xff] %v966_v31  ;;  %v968_v39 = vmul.f32 0.003921569, %v727_v32  ;;  %v731_v40 = vcvt.s32.f32 %v491_v33  ;;  %v732_v41 = vcvt.s32.f32 %v492_v34  ;;  %v253_v42 = vunpack.c.0.s8 %v151_v30  ;;  %v155_v34 = vld [vmem:[%s1753_s29 + $0x90] sm:$0xff] }
  0x6d   : > { %1207 = vst [vmem:[%s1766_s16 + $0x188] sm:$0xff] %v967_v35  ;;  %v969_v44 = vmul.f32 0.003921569, %v728_v36  ;;  %v970_v45 = vmul.f32 0.003921569, %v729_v37  ;;  %v254_v47 = vunpack.c.1.s8 %v151_v30  ;;  %v255_v51 = vunpack.c.2.s8 %v151_v30 }
  0x6e   : > { %v971_v46 = vmul.f32 0.003921569, %v730_v38  ;;  %1208 = vst [vmem:[%s1766_s16 + $0x190] sm:$0xff] %v968_v39  ;;  %v972_v48 = vmul.f32 0.003921569, %v731_v40  ;;  %v493_v50 = vand.u32 255, %v253_v42  ;;  %v256_v53 = vunpack.c.3.s8 %v151_v30 }
  0x6f   : > { %v973_v49 = vmul.f32 0.003921569, %v732_v41  ;;  %1209 = vst [vmem:[%s1766_s16 + $0x198] sm:$0xff] %v969_v44  ;;  %1210 = vst [vmem:[%s1766_s16 + $0x1a0] sm:$0xff] %v970_v45  ;;  %v494_v52 = vand.u32 255, %v254_v47  ;;  %v257_v54 = vunpack.c.0.s8 %v152_v43  ;;  %v258_v55 = vunpack.c.1.s8 %v152_v43  ;;  %v156_v47 = vld [vmem:[%s1753_s29 + $0x98] sm:$0xff] }
  0x70   : > { %1211 = vst [vmem:[%s1766_s16 + $0x1a8] sm:$0xff] %v971_v46  ;;  %1212 = vst [vmem:[%s1766_s16 + $0x1b0] sm:$0xff] %v972_v48  ;;  %v733_v56 = vcvt.s32.f32 %v493_v50  ;;  %v495_v57 = vand.u32 255, %v255_v51  ;;  %v259_v58 = vunpack.c.2.s8 %v152_v43  ;;  %v260_v59 = vunpack.c.3.s8 %v152_v43 }
  0x71   : > { %1213 = vst [vmem:[%s1766_s16 + $0x1b8] sm:$0xff] %v973_v49  ;;  %v734_v60 = vcvt.s32.f32 %v494_v52  ;;  %v496_v61 = vand.u32 255, %v256_v53  ;;  %v497_v62 = vand.u32 255, %v257_v54  ;;  %v498_v63 = vand.u32 255, %v258_v55 }
  0x72   : > { %v974_v1 = vmul.f32 0.003921569, %v733_v56  ;;  %v735_v2 = vcvt.s32.f32 %v495_v57  ;;  %v499_v3 = vand.u32 255, %v259_v58  ;;  %v500_v4 = vand.u32 255, %v260_v59 }
  0x73   : > { %v975_v5 = vmul.f32 0.003921569, %v734_v60  ;;  %v736_v6 = vcvt.s32.f32 %v496_v61  ;;  %v737_v7 = vcvt.s32.f32 %v497_v62  ;;  %v738_v8 = vcvt.s32.f32 %v498_v63 }
  0x74   : > { %1214 = vst [vmem:[%s1766_s16 + $0x1c0] sm:$0xff] %v974_v1  ;;  %v976_v9 = vmul.f32 0.003921569, %v735_v2  ;;  %v739_v10 = vcvt.s32.f32 %v499_v3  ;;  %v740_v11 = vcvt.s32.f32 %v500_v4  ;;  %v261_v12 = vunpack.c.0.s8 %v153_v0  ;;  %v157_v4 = vld [vmem:[%s1753_s29 + $0xa0] sm:$0xff] }
  0x75   : > { %1215 = vst [vmem:[%s1766_s16 + $0x1c8] sm:$0xff] %v975_v5  ;;  %v977_v14 = vmul.f32 0.003921569, %v736_v6  ;;  %v978_v15 = vmul.f32 0.003921569, %v737_v7  ;;  %v262_v17 = vunpack.c.1.s8 %v153_v0  ;;  %v263_v21 = vunpack.c.2.s8 %v153_v0 }
  0x76   : > { %v979_v16 = vmul.f32 0.003921569, %v738_v8  ;;  %1216 = vst [vmem:[%s1766_s16 + $0x1d0] sm:$0xff] %v976_v9  ;;  %v980_v18 = vmul.f32 0.003921569, %v739_v10  ;;  %v501_v20 = vand.u32 255, %v261_v12  ;;  %v264_v23 = vunpack.c.3.s8 %v153_v0 }
  0x77   : > { %v981_v19 = vmul.f32 0.003921569, %v740_v11  ;;  %1217 = vst [vmem:[%s1766_s16 + $0x1d8] sm:$0xff] %v977_v14  ;;  %1218 = vst [vmem:[%s1766_s16 + $0x1e0] sm:$0xff] %v978_v15  ;;  %v502_v22 = vand.u32 255, %v262_v17  ;;  %v265_v24 = vunpack.c.0.s8 %v154_v13  ;;  %v266_v25 = vunpack.c.1.s8 %v154_v13  ;;  %v158_v17 = vld [vmem:[%s1753_s29 + $0xa8] sm:$0xff] }
  0x78   : > { %1219 = vst [vmem:[%s1766_s16 + $0x1e8] sm:$0xff] %v979_v16  ;;  %1220 = vst [vmem:[%s1766_s16 + $0x1f0] sm:$0xff] %v980_v18  ;;  %v741_v26 = vcvt.s32.f32 %v501_v20  ;;  %v503_v27 = vand.u32 255, %v263_v21  ;;  %v267_v28 = vunpack.c.2.s8 %v154_v13  ;;  %v268_v29 = vunpack.c.3.s8 %v154_v13 }
  0x79   : > { %1221 = vst [vmem:[%s1766_s16 + $0x1f8] sm:$0xff] %v981_v19  ;;  %v742_v30 = vcvt.s32.f32 %v502_v22  ;;  %v504_v31 = vand.u32 255, %v264_v23  ;;  %v505_v32 = vand.u32 255, %v265_v24  ;;  %v506_v33 = vand.u32 255, %v266_v25 }
  0x7a   : > { %v982_v35 = vmul.f32 0.003921569, %v741_v26  ;;  %v743_v36 = vcvt.s32.f32 %v503_v27  ;;  %v507_v37 = vand.u32 255, %v267_v28  ;;  %v508_v38 = vand.u32 255, %v268_v29 }
  0x7b   : > { %v983_v39 = vmul.f32 0.003921569, %v742_v30  ;;  %v744_v40 = vcvt.s32.f32 %v504_v31  ;;  %v745_v41 = vcvt.s32.f32 %v505_v32  ;;  %v746_v42 = vcvt.s32.f32 %v506_v33 }
  0x7c   : > { %1222 = vst [vmem:[%s1766_s16 + $0x200] sm:$0xff] %v982_v35  ;;  %v984_v43 = vmul.f32 0.003921569, %v743_v36  ;;  %v747_v44 = vcvt.s32.f32 %v507_v37  ;;  %v748_v45 = vcvt.s32.f32 %v508_v38  ;;  %v269_v46 = vunpack.c.0.s8 %v155_v34  ;;  %v159_v38 = vld [vmem:[%s1753_s29 + $0xb0] sm:$0xff] }
  0x7d   : > { %1223 = vst [vmem:[%s1766_s16 + $0x208] sm:$0xff] %v983_v39  ;;  %v985_v48 = vmul.f32 0.003921569, %v744_v40  ;;  %v986_v49 = vmul.f32 0.003921569, %v745_v41  ;;  %v270_v51 = vunpack.c.1.s8 %v155_v34  ;;  %v271_v55 = vunpack.c.2.s8 %v155_v34 }
  0x7e   : > { %v987_v50 = vmul.f32 0.003921569, %v746_v42  ;;  %1224 = vst [vmem:[%s1766_s16 + $0x210] sm:$0xff] %v984_v43  ;;  %v988_v52 = vmul.f32 0.003921569, %v747_v44  ;;  %v509_v54 = vand.u32 255, %v269_v46  ;;  %v272_v57 = vunpack.c.3.s8 %v155_v34 }
  0x7f   : > { %v989_v53 = vmul.f32 0.003921569, %v748_v45  ;;  %1225 = vst [vmem:[%s1766_s16 + $0x218] sm:$0xff] %v985_v48  ;;  %1226 = vst [vmem:[%s1766_s16 + $0x220] sm:$0xff] %v986_v49  ;;  %v510_v56 = vand.u32 255, %v270_v51  ;;  %v273_v58 = vunpack.c.0.s8 %v156_v47  ;;  %v274_v59 = vunpack.c.1.s8 %v156_v47  ;;  %v160_v51 = vld [vmem:[%s1753_s29 + $0xb8] sm:$0xff] }
  0x80   : > { %1227 = vst [vmem:[%s1766_s16 + $0x228] sm:$0xff] %v987_v50  ;;  %1228 = vst [vmem:[%s1766_s16 + $0x230] sm:$0xff] %v988_v52  ;;  %v749_v60 = vcvt.s32.f32 %v509_v54  ;;  %v511_v61 = vand.u32 255, %v271_v55  ;;  %v275_v62 = vunpack.c.2.s8 %v156_v47  ;;  %v276_v63 = vunpack.c.3.s8 %v156_v47 }
  0x81   : > { %1229 = vst [vmem:[%s1766_s16 + $0x238] sm:$0xff] %v989_v53  ;;  %v750_v0 = vcvt.s32.f32 %v510_v56  ;;  %v512_v1 = vand.u32 255, %v272_v57  ;;  %v513_v2 = vand.u32 255, %v273_v58  ;;  %v514_v3 = vand.u32 255, %v274_v59 }
  0x82   : > { %v990_v5 = vmul.f32 0.003921569, %v749_v60  ;;  %v751_v6 = vcvt.s32.f32 %v511_v61  ;;  %v515_v7 = vand.u32 255, %v275_v62  ;;  %v516_v8 = vand.u32 255, %v276_v63 }
  0x83   : > { %v991_v9 = vmul.f32 0.003921569, %v750_v0  ;;  %v752_v10 = vcvt.s32.f32 %v512_v1  ;;  %v753_v11 = vcvt.s32.f32 %v513_v2  ;;  %v754_v12 = vcvt.s32.f32 %v514_v3 }
  0x84   : > { %1230 = vst [vmem:[%s1766_s16 + $0x240] sm:$0xff] %v990_v5  ;;  %v992_v13 = vmul.f32 0.003921569, %v751_v6  ;;  %v755_v14 = vcvt.s32.f32 %v515_v7  ;;  %v756_v15 = vcvt.s32.f32 %v516_v8  ;;  %v277_v16 = vunpack.c.0.s8 %v157_v4  ;;  %v161_v8 = vld [vmem:[%s1753_s29 + $0xc0] sm:$0xff] }
  0x85   : > { %1231 = vst [vmem:[%s1766_s16 + $0x248] sm:$0xff] %v991_v9  ;;  %v993_v18 = vmul.f32 0.003921569, %v752_v10  ;;  %v994_v19 = vmul.f32 0.003921569, %v753_v11  ;;  %v278_v21 = vunpack.c.1.s8 %v157_v4  ;;  %v279_v25 = vunpack.c.2.s8 %v157_v4 }
  0x86   : > { %v995_v20 = vmul.f32 0.003921569, %v754_v12  ;;  %1232 = vst [vmem:[%s1766_s16 + $0x250] sm:$0xff] %v992_v13  ;;  %v996_v22 = vmul.f32 0.003921569, %v755_v14  ;;  %v517_v24 = vand.u32 255, %v277_v16  ;;  %v280_v27 = vunpack.c.3.s8 %v157_v4 }
  0x87   : > { %v997_v23 = vmul.f32 0.003921569, %v756_v15  ;;  %1233 = vst [vmem:[%s1766_s16 + $0x258] sm:$0xff] %v993_v18  ;;  %1234 = vst [vmem:[%s1766_s16 + $0x260] sm:$0xff] %v994_v19  ;;  %v518_v26 = vand.u32 255, %v278_v21  ;;  %v281_v28 = vunpack.c.0.s8 %v158_v17  ;;  %v282_v29 = vunpack.c.1.s8 %v158_v17  ;;  %v162_v21 = vld [vmem:[%s1753_s29 + $0xc8] sm:$0xff] }
  0x88   : > { %1235 = vst [vmem:[%s1766_s16 + $0x268] sm:$0xff] %v995_v20  ;;  %1236 = vst [vmem:[%s1766_s16 + $0x270] sm:$0xff] %v996_v22  ;;  %v757_v30 = vcvt.s32.f32 %v517_v24  ;;  %v519_v31 = vand.u32 255, %v279_v25  ;;  %v283_v32 = vunpack.c.2.s8 %v158_v17  ;;  %v284_v33 = vunpack.c.3.s8 %v158_v17 }
  0x89   : > { %1237 = vst [vmem:[%s1766_s16 + $0x278] sm:$0xff] %v997_v23  ;;  %v758_v34 = vcvt.s32.f32 %v518_v26  ;;  %v520_v35 = vand.u32 255, %v280_v27  ;;  %v521_v36 = vand.u32 255, %v281_v28  ;;  %v522_v37 = vand.u32 255, %v282_v29 }
  0x8a   : > { %v998_v39 = vmul.f32 0.003921569, %v757_v30  ;;  %v759_v40 = vcvt.s32.f32 %v519_v31  ;;  %v523_v41 = vand.u32 255, %v283_v32  ;;  %v524_v42 = vand.u32 255, %v284_v33 }
  0x8b   : > { %v999_v43 = vmul.f32 0.003921569, %v758_v34  ;;  %v760_v44 = vcvt.s32.f32 %v520_v35  ;;  %v761_v45 = vcvt.s32.f32 %v521_v36  ;;  %v762_v46 = vcvt.s32.f32 %v522_v37 }
  0x8c   : > { %1238 = vst [vmem:[%s1766_s16 + $0x280] sm:$0xff] %v998_v39  ;;  %v1000_v47 = vmul.f32 0.003921569, %v759_v40  ;;  %v763_v48 = vcvt.s32.f32 %v523_v41  ;;  %v764_v49 = vcvt.s32.f32 %v524_v42  ;;  %v285_v50 = vunpack.c.0.s8 %v159_v38  ;;  %v163_v42 = vld [vmem:[%s1753_s29 + $0xd0] sm:$0xff] }
  0x8d   : > { %1239 = vst [vmem:[%s1766_s16 + $0x288] sm:$0xff] %v999_v43  ;;  %v1001_v52 = vmul.f32 0.003921569, %v760_v44  ;;  %v1002_v53 = vmul.f32 0.003921569, %v761_v45  ;;  %v286_v55 = vunpack.c.1.s8 %v159_v38  ;;  %v287_v59 = vunpack.c.2.s8 %v159_v38 }
  0x8e   : > { %v1003_v54 = vmul.f32 0.003921569, %v762_v46  ;;  %1240 = vst [vmem:[%s1766_s16 + $0x290] sm:$0xff] %v1000_v47  ;;  %v1004_v56 = vmul.f32 0.003921569, %v763_v48  ;;  %v525_v58 = vand.u32 255, %v285_v50  ;;  %v288_v61 = vunpack.c.3.s8 %v159_v38 }
  0x8f   : > { %v1005_v57 = vmul.f32 0.003921569, %v764_v49  ;;  %1241 = vst [vmem:[%s1766_s16 + $0x298] sm:$0xff] %v1001_v52  ;;  %1242 = vst [vmem:[%s1766_s16 + $0x2a0] sm:$0xff] %v1002_v53  ;;  %v526_v60 = vand.u32 255, %v286_v55  ;;  %v289_v62 = vunpack.c.0.s8 %v160_v51  ;;  %v290_v63 = vunpack.c.1.s8 %v160_v51  ;;  %v164_v55 = vld [vmem:[%s1753_s29 + $0xd8] sm:$0xff] }
  0x90   : > { %1243 = vst [vmem:[%s1766_s16 + $0x2a8] sm:$0xff] %v1003_v54  ;;  %1244 = vst [vmem:[%s1766_s16 + $0x2b0] sm:$0xff] %v1004_v56  ;;  %v765_v0 = vcvt.s32.f32 %v525_v58  ;;  %v527_v1 = vand.u32 255, %v287_v59  ;;  %v291_v2 = vunpack.c.2.s8 %v160_v51  ;;  %v292_v3 = vunpack.c.3.s8 %v160_v51 }
  0x91   : > { %1245 = vst [vmem:[%s1766_s16 + $0x2b8] sm:$0xff] %v1005_v57  ;;  %v766_v4 = vcvt.s32.f32 %v526_v60  ;;  %v528_v5 = vand.u32 255, %v288_v61  ;;  %v529_v6 = vand.u32 255, %v289_v62  ;;  %v530_v7 = vand.u32 255, %v290_v63 }
  0x92   : > { %v1006_v9 = vmul.f32 0.003921569, %v765_v0  ;;  %v767_v10 = vcvt.s32.f32 %v527_v1  ;;  %v531_v11 = vand.u32 255, %v291_v2  ;;  %v532_v12 = vand.u32 255, %v292_v3 }
  0x93   : > { %v1007_v13 = vmul.f32 0.003921569, %v766_v4  ;;  %v768_v14 = vcvt.s32.f32 %v528_v5  ;;  %v769_v15 = vcvt.s32.f32 %v529_v6  ;;  %v770_v16 = vcvt.s32.f32 %v530_v7 }
  0x94   : > { %1246 = vst [vmem:[%s1766_s16 + $0x2c0] sm:$0xff] %v1006_v9  ;;  %v1008_v17 = vmul.f32 0.003921569, %v767_v10  ;;  %v771_v18 = vcvt.s32.f32 %v531_v11  ;;  %v772_v19 = vcvt.s32.f32 %v532_v12  ;;  %v293_v20 = vunpack.c.0.s8 %v161_v8  ;;  %v165_v12 = vld [vmem:[%s1753_s29 + $0xe0] sm:$0xff] }
  0x95   : > { %1247 = vst [vmem:[%s1766_s16 + $0x2c8] sm:$0xff] %v1007_v13  ;;  %v1009_v22 = vmul.f32 0.003921569, %v768_v14  ;;  %v1010_v23 = vmul.f32 0.003921569, %v769_v15  ;;  %v294_v25 = vunpack.c.1.s8 %v161_v8  ;;  %v295_v29 = vunpack.c.2.s8 %v161_v8 }
  0x96   : > { %v1011_v24 = vmul.f32 0.003921569, %v770_v16  ;;  %1248 = vst [vmem:[%s1766_s16 + $0x2d0] sm:$0xff] %v1008_v17  ;;  %v1012_v26 = vmul.f32 0.003921569, %v771_v18  ;;  %v533_v28 = vand.u32 255, %v293_v20  ;;  %v296_v31 = vunpack.c.3.s8 %v161_v8 }
  0x97   : > { %v1013_v27 = vmul.f32 0.003921569, %v772_v19  ;;  %1249 = vst [vmem:[%s1766_s16 + $0x2d8] sm:$0xff] %v1009_v22  ;;  %1250 = vst [vmem:[%s1766_s16 + $0x2e0] sm:$0xff] %v1010_v23  ;;  %v534_v30 = vand.u32 255, %v294_v25  ;;  %v297_v32 = vunpack.c.0.s8 %v162_v21  ;;  %v298_v33 = vunpack.c.1.s8 %v162_v21  ;;  %v166_v25 = vld [vmem:[%s1753_s29 + $0xe8] sm:$0xff] }
  0x98   : > { %1251 = vst [vmem:[%s1766_s16 + $0x2e8] sm:$0xff] %v1011_v24  ;;  %1252 = vst [vmem:[%s1766_s16 + $0x2f0] sm:$0xff] %v1012_v26  ;;  %v773_v34 = vcvt.s32.f32 %v533_v28  ;;  %v535_v35 = vand.u32 255, %v295_v29  ;;  %v299_v36 = vunpack.c.2.s8 %v162_v21  ;;  %v300_v37 = vunpack.c.3.s8 %v162_v21 }
  0x99   : > { %1253 = vst [vmem:[%s1766_s16 + $0x2f8] sm:$0xff] %v1013_v27  ;;  %v774_v38 = vcvt.s32.f32 %v534_v30  ;;  %v536_v39 = vand.u32 255, %v296_v31  ;;  %v537_v40 = vand.u32 255, %v297_v32  ;;  %v538_v41 = vand.u32 255, %v298_v33 }
  0x9a   : > { %v1014_v43 = vmul.f32 0.003921569, %v773_v34  ;;  %v775_v44 = vcvt.s32.f32 %v535_v35  ;;  %v539_v45 = vand.u32 255, %v299_v36  ;;  %v540_v46 = vand.u32 255, %v300_v37 }
  0x9b   : > { %v1015_v47 = vmul.f32 0.003921569, %v774_v38  ;;  %v776_v48 = vcvt.s32.f32 %v536_v39  ;;  %v777_v49 = vcvt.s32.f32 %v537_v40  ;;  %v778_v50 = vcvt.s32.f32 %v538_v41 }
  0x9c   : > { %1254 = vst [vmem:[%s1766_s16 + $0x300] sm:$0xff] %v1014_v43  ;;  %v1016_v51 = vmul.f32 0.003921569, %v775_v44  ;;  %v779_v52 = vcvt.s32.f32 %v539_v45  ;;  %v780_v53 = vcvt.s32.f32 %v540_v46  ;;  %v301_v54 = vunpack.c.0.s8 %v163_v42  ;;  %v167_v46 = vld [vmem:[%s1753_s29 + $0xf0] sm:$0xff] }
  0x9d   : > { %1255 = vst [vmem:[%s1766_s16 + $0x308] sm:$0xff] %v1015_v47  ;;  %v1017_v56 = vmul.f32 0.003921569, %v776_v48  ;;  %v1018_v57 = vmul.f32 0.003921569, %v777_v49  ;;  %v302_v59 = vunpack.c.1.s8 %v163_v42  ;;  %v303_v63 = vunpack.c.2.s8 %v163_v42 }
  0x9e   : > { %v1019_v58 = vmul.f32 0.003921569, %v778_v50  ;;  %1256 = vst [vmem:[%s1766_s16 + $0x310] sm:$0xff] %v1016_v51  ;;  %v1020_v60 = vmul.f32 0.003921569, %v779_v52  ;;  %v541_v62 = vand.u32 255, %v301_v54  ;;  %v304_v1 = vunpack.c.3.s8 %v163_v42 }
  0x9f   : > { %v1021_v61 = vmul.f32 0.003921569, %v780_v53  ;;  %1257 = vst [vmem:[%s1766_s16 + $0x318] sm:$0xff] %v1017_v56  ;;  %1258 = vst [vmem:[%s1766_s16 + $0x320] sm:$0xff] %v1018_v57  ;;  %v542_v0 = vand.u32 255, %v302_v59  ;;  %v305_v2 = vunpack.c.0.s8 %v164_v55  ;;  %v306_v3 = vunpack.c.1.s8 %v164_v55  ;;  %v168_v59 = vld [vmem:[%s1753_s29 + $0xf8] sm:$0xff] }
  0xa0   : > { %1259 = vst [vmem:[%s1766_s16 + $0x328] sm:$0xff] %v1019_v58  ;;  %1260 = vst [vmem:[%s1766_s16 + $0x330] sm:$0xff] %v1020_v60  ;;  %v781_v4 = vcvt.s32.f32 %v541_v62  ;;  %v543_v5 = vand.u32 255, %v303_v63  ;;  %v307_v6 = vunpack.c.2.s8 %v164_v55  ;;  %v308_v7 = vunpack.c.3.s8 %v164_v55 }
  0xa1   : > { %1261 = vst [vmem:[%s1766_s16 + $0x338] sm:$0xff] %v1021_v61  ;;  %v782_v8 = vcvt.s32.f32 %v542_v0  ;;  %v544_v9 = vand.u32 255, %v304_v1  ;;  %v545_v10 = vand.u32 255, %v305_v2  ;;  %v546_v11 = vand.u32 255, %v306_v3 }
  0xa2   : > { %v1022_v13 = vmul.f32 0.003921569, %v781_v4  ;;  %v783_v14 = vcvt.s32.f32 %v543_v5  ;;  %v547_v15 = vand.u32 255, %v307_v6  ;;  %v548_v16 = vand.u32 255, %v308_v7 }
  0xa3   : > { %v1023_v17 = vmul.f32 0.003921569, %v782_v8  ;;  %v784_v18 = vcvt.s32.f32 %v544_v9  ;;  %v785_v19 = vcvt.s32.f32 %v545_v10  ;;  %v786_v20 = vcvt.s32.f32 %v546_v11 }
  0xa4   : > { %1262 = vst [vmem:[%s1766_s16 + $0x340] sm:$0xff] %v1022_v13  ;;  %v1024_v21 = vmul.f32 0.003921569, %v783_v14  ;;  %v787_v22 = vcvt.s32.f32 %v547_v15  ;;  %v788_v23 = vcvt.s32.f32 %v548_v16  ;;  %v309_v24 = vunpack.c.0.s8 %v165_v12  ;;  %v169_v16 = vld [vmem:[%s1753_s29 + $0x100] sm:$0xff] }
  0xa5   : > { %1263 = vst [vmem:[%s1766_s16 + $0x348] sm:$0xff] %v1023_v17  ;;  %v1025_v26 = vmul.f32 0.003921569, %v784_v18  ;;  %v1026_v27 = vmul.f32 0.003921569, %v785_v19  ;;  %v310_v29 = vunpack.c.1.s8 %v165_v12  ;;  %v311_v33 = vunpack.c.2.s8 %v165_v12 }
  0xa6   : > { %v1027_v28 = vmul.f32 0.003921569, %v786_v20  ;;  %1264 = vst [vmem:[%s1766_s16 + $0x350] sm:$0xff] %v1024_v21  ;;  %v1028_v30 = vmul.f32 0.003921569, %v787_v22  ;;  %v549_v32 = vand.u32 255, %v309_v24  ;;  %v312_v35 = vunpack.c.3.s8 %v165_v12 }
  0xa7   : > { %v1029_v31 = vmul.f32 0.003921569, %v788_v23  ;;  %1265 = vst [vmem:[%s1766_s16 + $0x358] sm:$0xff] %v1025_v26  ;;  %1266 = vst [vmem:[%s1766_s16 + $0x360] sm:$0xff] %v1026_v27  ;;  %v550_v34 = vand.u32 255, %v310_v29  ;;  %v313_v36 = vunpack.c.0.s8 %v166_v25  ;;  %v314_v37 = vunpack.c.1.s8 %v166_v25  ;;  %v170_v29 = vld [vmem:[%s1753_s29 + $0x108] sm:$0xff] }
  0xa8   : > { %1267 = vst [vmem:[%s1766_s16 + $0x368] sm:$0xff] %v1027_v28  ;;  %1268 = vst [vmem:[%s1766_s16 + $0x370] sm:$0xff] %v1028_v30  ;;  %v789_v38 = vcvt.s32.f32 %v549_v32  ;;  %v551_v39 = vand.u32 255, %v311_v33  ;;  %v315_v40 = vunpack.c.2.s8 %v166_v25  ;;  %v316_v41 = vunpack.c.3.s8 %v166_v25 }
  0xa9   : > { %1269 = vst [vmem:[%s1766_s16 + $0x378] sm:$0xff] %v1029_v31  ;;  %v790_v42 = vcvt.s32.f32 %v550_v34  ;;  %v552_v43 = vand.u32 255, %v312_v35  ;;  %v553_v44 = vand.u32 255, %v313_v36  ;;  %v554_v45 = vand.u32 255, %v314_v37 }
  0xaa   : > { %v1030_v47 = vmul.f32 0.003921569, %v789_v38  ;;  %v791_v48 = vcvt.s32.f32 %v551_v39  ;;  %v555_v49 = vand.u32 255, %v315_v40  ;;  %v556_v50 = vand.u32 255, %v316_v41 }
  0xab   : > { %v1031_v51 = vmul.f32 0.003921569, %v790_v42  ;;  %v792_v52 = vcvt.s32.f32 %v552_v43  ;;  %v793_v53 = vcvt.s32.f32 %v553_v44  ;;  %v794_v54 = vcvt.s32.f32 %v554_v45 }
  0xac   : > { %1270 = vst [vmem:[%s1766_s16 + $0x380] sm:$0xff] %v1030_v47  ;;  %v1032_v55 = vmul.f32 0.003921569, %v791_v48  ;;  %v795_v56 = vcvt.s32.f32 %v555_v49  ;;  %v796_v57 = vcvt.s32.f32 %v556_v50  ;;  %v317_v58 = vunpack.c.0.s8 %v167_v46  ;;  %v171_v50 = vld [vmem:[%s1753_s29 + $0x110] sm:$0xff] }
  0xad   : > { %1271 = vst [vmem:[%s1766_s16 + $0x388] sm:$0xff] %v1031_v51  ;;  %v1033_v60 = vmul.f32 0.003921569, %v792_v52  ;;  %v1034_v61 = vmul.f32 0.003921569, %v793_v53  ;;  %v318_v63 = vunpack.c.1.s8 %v167_v46  ;;  %v319_v3 = vunpack.c.2.s8 %v167_v46 }
  0xae   : > { %v1035_v62 = vmul.f32 0.003921569, %v794_v54  ;;  %1272 = vst [vmem:[%s1766_s16 + $0x390] sm:$0xff] %v1032_v55  ;;  %v1036_v0 = vmul.f32 0.003921569, %v795_v56  ;;  %v557_v2 = vand.u32 255, %v317_v58  ;;  %v320_v5 = vunpack.c.3.s8 %v167_v46 }
  0xaf   : > { %v1037_v1 = vmul.f32 0.003921569, %v796_v57  ;;  %1273 = vst [vmem:[%s1766_s16 + $0x398] sm:$0xff] %v1033_v60  ;;  %1274 = vst [vmem:[%s1766_s16 + $0x3a0] sm:$0xff] %v1034_v61  ;;  %v558_v4 = vand.u32 255, %v318_v63  ;;  %v321_v6 = vunpack.c.0.s8 %v168_v59  ;;  %v322_v7 = vunpack.c.1.s8 %v168_v59  ;;  %v172_v63 = vld [vmem:[%s1753_s29 + $0x118] sm:$0xff] }
  0xb0   : > { %1275 = vst [vmem:[%s1766_s16 + $0x3a8] sm:$0xff] %v1035_v62  ;;  %1276 = vst [vmem:[%s1766_s16 + $0x3b0] sm:$0xff] %v1036_v0  ;;  %v797_v8 = vcvt.s32.f32 %v557_v2  ;;  %v559_v9 = vand.u32 255, %v319_v3  ;;  %v323_v10 = vunpack.c.2.s8 %v168_v59  ;;  %v324_v11 = vunpack.c.3.s8 %v168_v59 }
  0xb1   : > { %1277 = vst [vmem:[%s1766_s16 + $0x3b8] sm:$0xff] %v1037_v1  ;;  %v798_v12 = vcvt.s32.f32 %v558_v4  ;;  %v560_v13 = vand.u32 255, %v320_v5  ;;  %v561_v14 = vand.u32 255, %v321_v6  ;;  %v562_v15 = vand.u32 255, %v322_v7 }
  0xb2   : > { %v1038_v17 = vmul.f32 0.003921569, %v797_v8  ;;  %v799_v18 = vcvt.s32.f32 %v559_v9  ;;  %v563_v19 = vand.u32 255, %v323_v10  ;;  %v564_v20 = vand.u32 255, %v324_v11 }
  0xb3   : > { %v1039_v21 = vmul.f32 0.003921569, %v798_v12  ;;  %v800_v22 = vcvt.s32.f32 %v560_v13  ;;  %v801_v23 = vcvt.s32.f32 %v561_v14  ;;  %v802_v24 = vcvt.s32.f32 %v562_v15 }
  0xb4   : > { %1278 = vst [vmem:[%s1766_s16 + $0x3c0] sm:$0xff] %v1038_v17  ;;  %v1040_v25 = vmul.f32 0.003921569, %v799_v18  ;;  %v803_v26 = vcvt.s32.f32 %v563_v19  ;;  %v804_v27 = vcvt.s32.f32 %v564_v20  ;;  %v325_v28 = vunpack.c.0.s8 %v169_v16  ;;  %v173_v20 = vld [vmem:[%s1753_s29 + $0x120] sm:$0xff] }
  0xb5   : > { %1279 = vst [vmem:[%s1766_s16 + $0x3c8] sm:$0xff] %v1039_v21  ;;  %v1041_v30 = vmul.f32 0.003921569, %v800_v22  ;;  %v1042_v31 = vmul.f32 0.003921569, %v801_v23  ;;  %v326_v33 = vunpack.c.1.s8 %v169_v16  ;;  %v327_v37 = vunpack.c.2.s8 %v169_v16 }
  0xb6   : > { %v1043_v32 = vmul.f32 0.003921569, %v802_v24  ;;  %1280 = vst [vmem:[%s1766_s16 + $0x3d0] sm:$0xff] %v1040_v25  ;;  %v1044_v34 = vmul.f32 0.003921569, %v803_v26  ;;  %v565_v36 = vand.u32 255, %v325_v28  ;;  %v328_v39 = vunpack.c.3.s8 %v169_v16 }
  0xb7   : > { %v1045_v35 = vmul.f32 0.003921569, %v804_v27  ;;  %1281 = vst [vmem:[%s1766_s16 + $0x3d8] sm:$0xff] %v1041_v30  ;;  %1282 = vst [vmem:[%s1766_s16 + $0x3e0] sm:$0xff] %v1042_v31  ;;  %v566_v38 = vand.u32 255, %v326_v33  ;;  %v329_v40 = vunpack.c.0.s8 %v170_v29  ;;  %v330_v41 = vunpack.c.1.s8 %v170_v29  ;;  %v174_v33 = vld [vmem:[%s1753_s29 + $0x128] sm:$0xff] }
  0xb8   : > { %1283 = vst [vmem:[%s1766_s16 + $0x3e8] sm:$0xff] %v1043_v32  ;;  %1284 = vst [vmem:[%s1766_s16 + $0x3f0] sm:$0xff] %v1044_v34  ;;  %v805_v42 = vcvt.s32.f32 %v565_v36  ;;  %v567_v43 = vand.u32 255, %v327_v37  ;;  %v331_v44 = vunpack.c.2.s8 %v170_v29  ;;  %v332_v45 = vunpack.c.3.s8 %v170_v29 }
  0xb9   : > { %1285 = vst [vmem:[%s1766_s16 + $0x3f8] sm:$0xff] %v1045_v35  ;;  %v806_v46 = vcvt.s32.f32 %v566_v38  ;;  %v568_v47 = vand.u32 255, %v328_v39  ;;  %v569_v48 = vand.u32 255, %v329_v40  ;;  %v570_v49 = vand.u32 255, %v330_v41 }
  0xba   : > { %v1046_v51 = vmul.f32 0.003921569, %v805_v42  ;;  %v807_v52 = vcvt.s32.f32 %v567_v43  ;;  %v571_v53 = vand.u32 255, %v331_v44  ;;  %v572_v54 = vand.u32 255, %v332_v45 }
  0xbb   : > { %v1047_v55 = vmul.f32 0.003921569, %v806_v46  ;;  %v808_v56 = vcvt.s32.f32 %v568_v47  ;;  %v809_v57 = vcvt.s32.f32 %v569_v48  ;;  %v810_v58 = vcvt.s32.f32 %v570_v49 }
  0xbc   : > { %1286 = vst [vmem:[%s1766_s16 + $0x400] sm:$0xff] %v1046_v51  ;;  %v1048_v59 = vmul.f32 0.003921569, %v807_v52  ;;  %v811_v60 = vcvt.s32.f32 %v571_v53  ;;  %v812_v61 = vcvt.s32.f32 %v572_v54  ;;  %v333_v62 = vunpack.c.0.s8 %v171_v50  ;;  %v175_v54 = vld [vmem:[%s1753_s29 + $0x130] sm:$0xff] }
  0xbd   : > { %1287 = vst [vmem:[%s1766_s16 + $0x408] sm:$0xff] %v1047_v55  ;;  %v1049_v0 = vmul.f32 0.003921569, %v808_v56  ;;  %v1050_v1 = vmul.f32 0.003921569, %v809_v57  ;;  %v334_v3 = vunpack.c.1.s8 %v171_v50  ;;  %v335_v7 = vunpack.c.2.s8 %v171_v50 }
  0xbe   : > { %v1051_v2 = vmul.f32 0.003921569, %v810_v58  ;;  %1288 = vst [vmem:[%s1766_s16 + $0x410] sm:$0xff] %v1048_v59  ;;  %v1052_v4 = vmul.f32 0.003921569, %v811_v60  ;;  %v573_v6 = vand.u32 255, %v333_v62  ;;  %v336_v9 = vunpack.c.3.s8 %v171_v50 }
  0xbf   : > { %v1053_v5 = vmul.f32 0.003921569, %v812_v61  ;;  %1289 = vst [vmem:[%s1766_s16 + $0x418] sm:$0xff] %v1049_v0  ;;  %1290 = vst [vmem:[%s1766_s16 + $0x420] sm:$0xff] %v1050_v1  ;;  %v574_v8 = vand.u32 255, %v334_v3  ;;  %v337_v10 = vunpack.c.0.s8 %v172_v63  ;;  %v338_v11 = vunpack.c.1.s8 %v172_v63  ;;  %v176_v3 = vld [vmem:[%s1753_s29 + $0x138] sm:$0xff] }
  0xc0   : > { %1291 = vst [vmem:[%s1766_s16 + $0x428] sm:$0xff] %v1051_v2  ;;  %1292 = vst [vmem:[%s1766_s16 + $0x430] sm:$0xff] %v1052_v4  ;;  %v813_v12 = vcvt.s32.f32 %v573_v6  ;;  %v575_v13 = vand.u32 255, %v335_v7  ;;  %v339_v14 = vunpack.c.2.s8 %v172_v63  ;;  %v340_v15 = vunpack.c.3.s8 %v172_v63 }
  0xc1   : > { %1293 = vst [vmem:[%s1766_s16 + $0x438] sm:$0xff] %v1053_v5  ;;  %v814_v16 = vcvt.s32.f32 %v574_v8  ;;  %v576_v17 = vand.u32 255, %v336_v9  ;;  %v577_v18 = vand.u32 255, %v337_v10  ;;  %v578_v19 = vand.u32 255, %v338_v11 }
  0xc2   : > { %v1054_v21 = vmul.f32 0.003921569, %v813_v12  ;;  %v815_v22 = vcvt.s32.f32 %v575_v13  ;;  %v579_v23 = vand.u32 255, %v339_v14  ;;  %v580_v24 = vand.u32 255, %v340_v15 }
  0xc3   : > { %v1055_v25 = vmul.f32 0.003921569, %v814_v16  ;;  %v816_v26 = vcvt.s32.f32 %v576_v17  ;;  %v817_v27 = vcvt.s32.f32 %v577_v18  ;;  %v818_v28 = vcvt.s32.f32 %v578_v19 }
  0xc4   : > { %1294 = vst [vmem:[%s1766_s16 + $0x440] sm:$0xff] %v1054_v21  ;;  %v1056_v29 = vmul.f32 0.003921569, %v815_v22  ;;  %v819_v30 = vcvt.s32.f32 %v579_v23  ;;  %v820_v31 = vcvt.s32.f32 %v580_v24  ;;  %v341_v32 = vunpack.c.0.s8 %v173_v20  ;;  %v177_v24 = vld [vmem:[%s1753_s29 + $0x140] sm:$0xff] }
  0xc5   : > { %1295 = vst [vmem:[%s1766_s16 + $0x448] sm:$0xff] %v1055_v25  ;;  %v1057_v34 = vmul.f32 0.003921569, %v816_v26  ;;  %v1058_v35 = vmul.f32 0.003921569, %v817_v27  ;;  %v342_v37 = vunpack.c.1.s8 %v173_v20  ;;  %v343_v41 = vunpack.c.2.s8 %v173_v20 }
  0xc6   : > { %v1059_v36 = vmul.f32 0.003921569, %v818_v28  ;;  %1296 = vst [vmem:[%s1766_s16 + $0x450] sm:$0xff] %v1056_v29  ;;  %v1060_v38 = vmul.f32 0.003921569, %v819_v30  ;;  %v581_v40 = vand.u32 255, %v341_v32  ;;  %v344_v43 = vunpack.c.3.s8 %v173_v20 }
  0xc7   : > { %v1061_v39 = vmul.f32 0.003921569, %v820_v31  ;;  %1297 = vst [vmem:[%s1766_s16 + $0x458] sm:$0xff] %v1057_v34  ;;  %1298 = vst [vmem:[%s1766_s16 + $0x460] sm:$0xff] %v1058_v35  ;;  %v582_v42 = vand.u32 255, %v342_v37  ;;  %v345_v44 = vunpack.c.0.s8 %v174_v33  ;;  %v346_v45 = vunpack.c.1.s8 %v174_v33  ;;  %v178_v37 = vld [vmem:[%s1753_s29 + $0x148] sm:$0xff] }
  0xc8   : > { %1299 = vst [vmem:[%s1766_s16 + $0x468] sm:$0xff] %v1059_v36  ;;  %1300 = vst [vmem:[%s1766_s16 + $0x470] sm:$0xff] %v1060_v38  ;;  %v821_v46 = vcvt.s32.f32 %v581_v40  ;;  %v583_v47 = vand.u32 255, %v343_v41  ;;  %v347_v48 = vunpack.c.2.s8 %v174_v33  ;;  %v348_v49 = vunpack.c.3.s8 %v174_v33 }
  0xc9   : > { %1301 = vst [vmem:[%s1766_s16 + $0x478] sm:$0xff] %v1061_v39  ;;  %v822_v50 = vcvt.s32.f32 %v582_v42  ;;  %v584_v51 = vand.u32 255, %v344_v43  ;;  %v585_v52 = vand.u32 255, %v345_v44  ;;  %v586_v53 = vand.u32 255, %v346_v45 }
  0xca   : > { %v1062_v55 = vmul.f32 0.003921569, %v821_v46  ;;  %v823_v56 = vcvt.s32.f32 %v583_v47  ;;  %v587_v57 = vand.u32 255, %v347_v48  ;;  %v588_v58 = vand.u32 255, %v348_v49 }
  0xcb   : > { %v1063_v59 = vmul.f32 0.003921569, %v822_v50  ;;  %v824_v60 = vcvt.s32.f32 %v584_v51  ;;  %v825_v61 = vcvt.s32.f32 %v585_v52  ;;  %v826_v62 = vcvt.s32.f32 %v586_v53 }
  0xcc   : > { %1302 = vst [vmem:[%s1766_s16 + $0x480] sm:$0xff] %v1062_v55  ;;  %v1064_v63 = vmul.f32 0.003921569, %v823_v56  ;;  %v827_v0 = vcvt.s32.f32 %v587_v57  ;;  %v828_v1 = vcvt.s32.f32 %v588_v58  ;;  %v349_v2 = vunpack.c.0.s8 %v175_v54  ;;  %v179_v58 = vld [vmem:[%s1753_s29 + $0x150] sm:$0xff] }
  0xcd   : > { %1303 = vst [vmem:[%s1766_s16 + $0x488] sm:$0xff] %v1063_v59  ;;  %v1065_v4 = vmul.f32 0.003921569, %v824_v60  ;;  %v1066_v5 = vmul.f32 0.003921569, %v825_v61  ;;  %v350_v7 = vunpack.c.1.s8 %v175_v54  ;;  %v351_v11 = vunpack.c.2.s8 %v175_v54 }
  0xce   : > { %v1067_v6 = vmul.f32 0.003921569, %v826_v62  ;;  %1304 = vst [vmem:[%s1766_s16 + $0x490] sm:$0xff] %v1064_v63  ;;  %v1068_v8 = vmul.f32 0.003921569, %v827_v0  ;;  %v589_v10 = vand.u32 255, %v349_v2  ;;  %v352_v13 = vunpack.c.3.s8 %v175_v54 }
  0xcf   : > { %v1069_v9 = vmul.f32 0.003921569, %v828_v1  ;;  %1305 = vst [vmem:[%s1766_s16 + $0x498] sm:$0xff] %v1065_v4  ;;  %1306 = vst [vmem:[%s1766_s16 + $0x4a0] sm:$0xff] %v1066_v5  ;;  %v590_v12 = vand.u32 255, %v350_v7  ;;  %v353_v14 = vunpack.c.0.s8 %v176_v3  ;;  %v354_v15 = vunpack.c.1.s8 %v176_v3  ;;  %v180_v7 = vld [vmem:[%s1753_s29 + $0x158] sm:$0xff] }
  0xd0   : > { %1307 = vst [vmem:[%s1766_s16 + $0x4a8] sm:$0xff] %v1067_v6  ;;  %1308 = vst [vmem:[%s1766_s16 + $0x4b0] sm:$0xff] %v1068_v8  ;;  %v829_v16 = vcvt.s32.f32 %v589_v10  ;;  %v591_v17 = vand.u32 255, %v351_v11  ;;  %v355_v18 = vunpack.c.2.s8 %v176_v3  ;;  %v356_v19 = vunpack.c.3.s8 %v176_v3 }
  0xd1   : > { %1309 = vst [vmem:[%s1766_s16 + $0x4b8] sm:$0xff] %v1069_v9  ;;  %v830_v20 = vcvt.s32.f32 %v590_v12  ;;  %v592_v21 = vand.u32 255, %v352_v13  ;;  %v593_v22 = vand.u32 255, %v353_v14  ;;  %v594_v23 = vand.u32 255, %v354_v15 }
  0xd2   : > { %v1070_v25 = vmul.f32 0.003921569, %v829_v16  ;;  %v831_v26 = vcvt.s32.f32 %v591_v17  ;;  %v595_v27 = vand.u32 255, %v355_v18  ;;  %v596_v28 = vand.u32 255, %v356_v19 }
  0xd3   : > { %v1071_v29 = vmul.f32 0.003921569, %v830_v20  ;;  %v832_v30 = vcvt.s32.f32 %v592_v21  ;;  %v833_v31 = vcvt.s32.f32 %v593_v22  ;;  %v834_v32 = vcvt.s32.f32 %v594_v23 }
  0xd4   : > { %1310 = vst [vmem:[%s1766_s16 + $0x4c0] sm:$0xff] %v1070_v25  ;;  %v1072_v33 = vmul.f32 0.003921569, %v831_v26  ;;  %v835_v34 = vcvt.s32.f32 %v595_v27  ;;  %v836_v35 = vcvt.s32.f32 %v596_v28  ;;  %v357_v36 = vunpack.c.0.s8 %v177_v24  ;;  %v181_v28 = vld [vmem:[%s1753_s29 + $0x160] sm:$0xff] }
  0xd5   : > { %1311 = vst [vmem:[%s1766_s16 + $0x4c8] sm:$0xff] %v1071_v29  ;;  %v1073_v38 = vmul.f32 0.003921569, %v832_v30  ;;  %v1074_v39 = vmul.f32 0.003921569, %v833_v31  ;;  %v358_v41 = vunpack.c.1.s8 %v177_v24  ;;  %v359_v45 = vunpack.c.2.s8 %v177_v24 }
  0xd6   : > { %v1075_v40 = vmul.f32 0.003921569, %v834_v32  ;;  %1312 = vst [vmem:[%s1766_s16 + $0x4d0] sm:$0xff] %v1072_v33  ;;  %v1076_v42 = vmul.f32 0.003921569, %v835_v34  ;;  %v597_v44 = vand.u32 255, %v357_v36  ;;  %v360_v47 = vunpack.c.3.s8 %v177_v24 }
  0xd7   : > { %v1077_v43 = vmul.f32 0.003921569, %v836_v35  ;;  %1313 = vst [vmem:[%s1766_s16 + $0x4d8] sm:$0xff] %v1073_v38  ;;  %1314 = vst [vmem:[%s1766_s16 + $0x4e0] sm:$0xff] %v1074_v39  ;;  %v598_v46 = vand.u32 255, %v358_v41  ;;  %v361_v48 = vunpack.c.0.s8 %v178_v37  ;;  %v362_v49 = vunpack.c.1.s8 %v178_v37  ;;  %v182_v41 = vld [vmem:[%s1753_s29 + $0x168] sm:$0xff] }
  0xd8   : > { %1315 = vst [vmem:[%s1766_s16 + $0x4e8] sm:$0xff] %v1075_v40  ;;  %1316 = vst [vmem:[%s1766_s16 + $0x4f0] sm:$0xff] %v1076_v42  ;;  %v837_v50 = vcvt.s32.f32 %v597_v44  ;;  %v599_v51 = vand.u32 255, %v359_v45  ;;  %v363_v52 = vunpack.c.2.s8 %v178_v37  ;;  %v364_v53 = vunpack.c.3.s8 %v178_v37 }
  0xd9   : > { %1317 = vst [vmem:[%s1766_s16 + $0x4f8] sm:$0xff] %v1077_v43  ;;  %v838_v54 = vcvt.s32.f32 %v598_v46  ;;  %v600_v55 = vand.u32 255, %v360_v47  ;;  %v601_v56 = vand.u32 255, %v361_v48  ;;  %v602_v57 = vand.u32 255, %v362_v49 }
  0xda   : > { %v1078_v59 = vmul.f32 0.003921569, %v837_v50  ;;  %v839_v60 = vcvt.s32.f32 %v599_v51  ;;  %v603_v61 = vand.u32 255, %v363_v52  ;;  %v604_v62 = vand.u32 255, %v364_v53 }
  0xdb   : > { %v1079_v63 = vmul.f32 0.003921569, %v838_v54  ;;  %v840_v0 = vcvt.s32.f32 %v600_v55  ;;  %v841_v1 = vcvt.s32.f32 %v601_v56  ;;  %v842_v2 = vcvt.s32.f32 %v602_v57 }
  0xdc   : > { %1318 = vst [vmem:[%s1766_s16 + $0x500] sm:$0xff] %v1078_v59  ;;  %v1080_v3 = vmul.f32 0.003921569, %v839_v60  ;;  %v843_v4 = vcvt.s32.f32 %v603_v61  ;;  %v844_v5 = vcvt.s32.f32 %v604_v62  ;;  %v365_v6 = vunpack.c.0.s8 %v179_v58  ;;  %v183_v62 = vld [vmem:[%s1753_s29 + $0x170] sm:$0xff] }
  0xdd   : > { %1319 = vst [vmem:[%s1766_s16 + $0x508] sm:$0xff] %v1079_v63  ;;  %v1081_v8 = vmul.f32 0.003921569, %v840_v0  ;;  %v1082_v9 = vmul.f32 0.003921569, %v841_v1  ;;  %v366_v11 = vunpack.c.1.s8 %v179_v58  ;;  %v367_v15 = vunpack.c.2.s8 %v179_v58 }
  0xde   : > { %v1083_v10 = vmul.f32 0.003921569, %v842_v2  ;;  %1320 = vst [vmem:[%s1766_s16 + $0x510] sm:$0xff] %v1080_v3  ;;  %v1084_v12 = vmul.f32 0.003921569, %v843_v4  ;;  %v605_v14 = vand.u32 255, %v365_v6  ;;  %v368_v17 = vunpack.c.3.s8 %v179_v58 }
  0xdf   : > { %v1085_v13 = vmul.f32 0.003921569, %v844_v5  ;;  %1321 = vst [vmem:[%s1766_s16 + $0x518] sm:$0xff] %v1081_v8  ;;  %1322 = vst [vmem:[%s1766_s16 + $0x520] sm:$0xff] %v1082_v9  ;;  %v606_v16 = vand.u32 255, %v366_v11  ;;  %v369_v18 = vunpack.c.0.s8 %v180_v7  ;;  %v370_v19 = vunpack.c.1.s8 %v180_v7  ;;  %v184_v11 = vld [vmem:[%s1753_s29 + $0x178] sm:$0xff] }
  0xe0   : > { %1323 = vst [vmem:[%s1766_s16 + $0x528] sm:$0xff] %v1083_v10  ;;  %1324 = vst [vmem:[%s1766_s16 + $0x530] sm:$0xff] %v1084_v12  ;;  %v845_v20 = vcvt.s32.f32 %v605_v14  ;;  %v607_v21 = vand.u32 255, %v367_v15  ;;  %v371_v22 = vunpack.c.2.s8 %v180_v7  ;;  %v372_v23 = vunpack.c.3.s8 %v180_v7 }
  0xe1   : > { %1325 = vst [vmem:[%s1766_s16 + $0x538] sm:$0xff] %v1085_v13  ;;  %v846_v24 = vcvt.s32.f32 %v606_v16  ;;  %v608_v25 = vand.u32 255, %v368_v17  ;;  %v609_v26 = vand.u32 255, %v369_v18  ;;  %v610_v27 = vand.u32 255, %v370_v19 }
  0xe2   : > { %v1086_v29 = vmul.f32 0.003921569, %v845_v20  ;;  %v847_v30 = vcvt.s32.f32 %v607_v21  ;;  %v611_v31 = vand.u32 255, %v371_v22  ;;  %v612_v32 = vand.u32 255, %v372_v23 }
  0xe3   : > { %v1087_v33 = vmul.f32 0.003921569, %v846_v24  ;;  %v848_v34 = vcvt.s32.f32 %v608_v25  ;;  %v849_v35 = vcvt.s32.f32 %v609_v26  ;;  %v850_v36 = vcvt.s32.f32 %v610_v27 }
  0xe4   : > { %1326 = vst [vmem:[%s1766_s16 + $0x540] sm:$0xff] %v1086_v29  ;;  %v1088_v37 = vmul.f32 0.003921569, %v847_v30  ;;  %v851_v38 = vcvt.s32.f32 %v611_v31  ;;  %v852_v39 = vcvt.s32.f32 %v612_v32  ;;  %v373_v40 = vunpack.c.0.s8 %v181_v28  ;;  %v185_v32 = vld [vmem:[%s1753_s29 + $0x180] sm:$0xff] }
  0xe5   : > { %1327 = vst [vmem:[%s1766_s16 + $0x548] sm:$0xff] %v1087_v33  ;;  %v1089_v42 = vmul.f32 0.003921569, %v848_v34  ;;  %v1090_v43 = vmul.f32 0.003921569, %v849_v35  ;;  %v374_v45 = vunpack.c.1.s8 %v181_v28  ;;  %v375_v49 = vunpack.c.2.s8 %v181_v28 }
  0xe6   : > { %v1091_v44 = vmul.f32 0.003921569, %v850_v36  ;;  %1328 = vst [vmem:[%s1766_s16 + $0x550] sm:$0xff] %v1088_v37  ;;  %v1092_v46 = vmul.f32 0.003921569, %v851_v38  ;;  %v613_v48 = vand.u32 255, %v373_v40  ;;  %v376_v51 = vunpack.c.3.s8 %v181_v28 }
  0xe7   : > { %v1093_v47 = vmul.f32 0.003921569, %v852_v39  ;;  %1329 = vst [vmem:[%s1766_s16 + $0x558] sm:$0xff] %v1089_v42  ;;  %1330 = vst [vmem:[%s1766_s16 + $0x560] sm:$0xff] %v1090_v43  ;;  %v614_v50 = vand.u32 255, %v374_v45  ;;  %v377_v52 = vunpack.c.0.s8 %v182_v41  ;;  %v378_v53 = vunpack.c.1.s8 %v182_v41  ;;  %v186_v45 = vld [vmem:[%s1753_s29 + $0x188] sm:$0xff] }
  0xe8   : > { %1331 = vst [vmem:[%s1766_s16 + $0x568] sm:$0xff] %v1091_v44  ;;  %1332 = vst [vmem:[%s1766_s16 + $0x570] sm:$0xff] %v1092_v46  ;;  %v853_v54 = vcvt.s32.f32 %v613_v48  ;;  %v615_v55 = vand.u32 255, %v375_v49  ;;  %v379_v56 = vunpack.c.2.s8 %v182_v41  ;;  %v380_v57 = vunpack.c.3.s8 %v182_v41 }
  0xe9   : > { %1333 = vst [vmem:[%s1766_s16 + $0x578] sm:$0xff] %v1093_v47  ;;  %v854_v58 = vcvt.s32.f32 %v614_v50  ;;  %v616_v59 = vand.u32 255, %v376_v51  ;;  %v617_v60 = vand.u32 255, %v377_v52  ;;  %v618_v61 = vand.u32 255, %v378_v53 }
  0xea   : > { %v1094_v63 = vmul.f32 0.003921569, %v853_v54  ;;  %v855_v0 = vcvt.s32.f32 %v615_v55  ;;  %v619_v1 = vand.u32 255, %v379_v56  ;;  %v620_v2 = vand.u32 255, %v380_v57 }
  0xeb   : > { %v1095_v3 = vmul.f32 0.003921569, %v854_v58  ;;  %v856_v4 = vcvt.s32.f32 %v616_v59  ;;  %v857_v5 = vcvt.s32.f32 %v617_v60  ;;  %v858_v6 = vcvt.s32.f32 %v618_v61 }
  0xec   : > { %1334 = vst [vmem:[%s1766_s16 + $0x580] sm:$0xff] %v1094_v63  ;;  %v1096_v7 = vmul.f32 0.003921569, %v855_v0  ;;  %v859_v8 = vcvt.s32.f32 %v619_v1  ;;  %v860_v9 = vcvt.s32.f32 %v620_v2  ;;  %v381_v10 = vunpack.c.0.s8 %v183_v62  ;;  %v187_v2 = vld [vmem:[%s1753_s29 + $0x190] sm:$0xff] }
  0xed   : > { %1335 = vst [vmem:[%s1766_s16 + $0x588] sm:$0xff] %v1095_v3  ;;  %v1097_v12 = vmul.f32 0.003921569, %v856_v4  ;;  %v1098_v13 = vmul.f32 0.003921569, %v857_v5  ;;  %v382_v15 = vunpack.c.1.s8 %v183_v62  ;;  %v383_v19 = vunpack.c.2.s8 %v183_v62 }
  0xee   : > { %v1099_v14 = vmul.f32 0.003921569, %v858_v6  ;;  %1336 = vst [vmem:[%s1766_s16 + $0x590] sm:$0xff] %v1096_v7  ;;  %v1100_v16 = vmul.f32 0.003921569, %v859_v8  ;;  %v621_v18 = vand.u32 255, %v381_v10  ;;  %v384_v21 = vunpack.c.3.s8 %v183_v62 }
  0xef   : > { %v1101_v17 = vmul.f32 0.003921569, %v860_v9  ;;  %1337 = vst [vmem:[%s1766_s16 + $0x598] sm:$0xff] %v1097_v12  ;;  %1338 = vst [vmem:[%s1766_s16 + $0x5a0] sm:$0xff] %v1098_v13  ;;  %v622_v20 = vand.u32 255, %v382_v15  ;;  %v385_v22 = vunpack.c.0.s8 %v184_v11  ;;  %v386_v23 = vunpack.c.1.s8 %v184_v11  ;;  %v188_v15 = vld [vmem:[%s1753_s29 + $0x198] sm:$0xff] }
  0xf0   : > { %1339 = vst [vmem:[%s1766_s16 + $0x5a8] sm:$0xff] %v1099_v14  ;;  %1340 = vst [vmem:[%s1766_s16 + $0x5b0] sm:$0xff] %v1100_v16  ;;  %v861_v24 = vcvt.s32.f32 %v621_v18  ;;  %v623_v25 = vand.u32 255, %v383_v19  ;;  %v387_v26 = vunpack.c.2.s8 %v184_v11  ;;  %v388_v27 = vunpack.c.3.s8 %v184_v11 }
  0xf1   : > { %1341 = vst [vmem:[%s1766_s16 + $0x5b8] sm:$0xff] %v1101_v17  ;;  %v862_v28 = vcvt.s32.f32 %v622_v20  ;;  %v624_v29 = vand.u32 255, %v384_v21  ;;  %v625_v30 = vand.u32 255, %v385_v22  ;;  %v626_v31 = vand.u32 255, %v386_v23 }
  0xf2   : > { %v1102_v33 = vmul.f32 0.003921569, %v861_v24  ;;  %v863_v34 = vcvt.s32.f32 %v623_v25  ;;  %v627_v35 = vand.u32 255, %v387_v26  ;;  %v628_v36 = vand.u32 255, %v388_v27 }
  0xf3   : > { %v1103_v37 = vmul.f32 0.003921569, %v862_v28  ;;  %v864_v38 = vcvt.s32.f32 %v624_v29  ;;  %v865_v39 = vcvt.s32.f32 %v625_v30  ;;  %v866_v40 = vcvt.s32.f32 %v626_v31 }
  0xf4   : > { %1342 = vst [vmem:[%s1766_s16 + $0x5c0] sm:$0xff] %v1102_v33  ;;  %v1104_v41 = vmul.f32 0.003921569, %v863_v34  ;;  %v867_v42 = vcvt.s32.f32 %v627_v35  ;;  %v868_v43 = vcvt.s32.f32 %v628_v36  ;;  %v389_v44 = vunpack.c.0.s8 %v185_v32  ;;  %v189_v36 = vld [vmem:[%s1753_s29 + $0x1a0] sm:$0xff] }
  0xf5   : > { %1343 = vst [vmem:[%s1766_s16 + $0x5c8] sm:$0xff] %v1103_v37  ;;  %v1105_v46 = vmul.f32 0.003921569, %v864_v38  ;;  %v1106_v47 = vmul.f32 0.003921569, %v865_v39  ;;  %v390_v49 = vunpack.c.1.s8 %v185_v32  ;;  %v391_v53 = vunpack.c.2.s8 %v185_v32 }
  0xf6   : > { %v1107_v48 = vmul.f32 0.003921569, %v866_v40  ;;  %1344 = vst [vmem:[%s1766_s16 + $0x5d0] sm:$0xff] %v1104_v41  ;;  %v1108_v50 = vmul.f32 0.003921569, %v867_v42  ;;  %v629_v52 = vand.u32 255, %v389_v44  ;;  %v392_v55 = vunpack.c.3.s8 %v185_v32 }
  0xf7   : > { %v1109_v51 = vmul.f32 0.003921569, %v868_v43  ;;  %1345 = vst [vmem:[%s1766_s16 + $0x5d8] sm:$0xff] %v1105_v46  ;;  %1346 = vst [vmem:[%s1766_s16 + $0x5e0] sm:$0xff] %v1106_v47  ;;  %v630_v54 = vand.u32 255, %v390_v49  ;;  %v393_v56 = vunpack.c.0.s8 %v186_v45  ;;  %v394_v57 = vunpack.c.1.s8 %v186_v45  ;;  %v190_v49 = vld [vmem:[%s1753_s29 + $0x1a8] sm:$0xff] }
  0xf8   : > { %1347 = vst [vmem:[%s1766_s16 + $0x5e8] sm:$0xff] %v1107_v48  ;;  %1348 = vst [vmem:[%s1766_s16 + $0x5f0] sm:$0xff] %v1108_v50  ;;  %v869_v58 = vcvt.s32.f32 %v629_v52  ;;  %v631_v59 = vand.u32 255, %v391_v53  ;;  %v395_v60 = vunpack.c.2.s8 %v186_v45  ;;  %v396_v61 = vunpack.c.3.s8 %v186_v45 }
  0xf9   : > { %1349 = vst [vmem:[%s1766_s16 + $0x5f8] sm:$0xff] %v1109_v51  ;;  %v870_v62 = vcvt.s32.f32 %v630_v54  ;;  %v632_v63 = vand.u32 255, %v392_v55  ;;  %v633_v0 = vand.u32 255, %v393_v56  ;;  %v634_v1 = vand.u32 255, %v394_v57 }
  0xfa   : > { %v1110_v3 = vmul.f32 0.003921569, %v869_v58  ;;  %v871_v4 = vcvt.s32.f32 %v631_v59  ;;  %v635_v5 = vand.u32 255, %v395_v60  ;;  %v636_v6 = vand.u32 255, %v396_v61 }
  0xfb   : > { %v1111_v7 = vmul.f32 0.003921569, %v870_v62  ;;  %v872_v8 = vcvt.s32.f32 %v632_v63  ;;  %v873_v9 = vcvt.s32.f32 %v633_v0  ;;  %v874_v10 = vcvt.s32.f32 %v634_v1 }
  0xfc   : > { %1350 = vst [vmem:[%s1766_s16 + $0x600] sm:$0xff] %v1110_v3  ;;  %v1112_v11 = vmul.f32 0.003921569, %v871_v4  ;;  %v875_v12 = vcvt.s32.f32 %v635_v5  ;;  %v876_v13 = vcvt.s32.f32 %v636_v6  ;;  %v397_v14 = vunpack.c.0.s8 %v187_v2  ;;  %v191_v6 = vld [vmem:[%s1753_s29 + $0x1b0] sm:$0xff] }
  0xfd   : > { %1351 = vst [vmem:[%s1766_s16 + $0x608] sm:$0xff] %v1111_v7  ;;  %v1113_v16 = vmul.f32 0.003921569, %v872_v8  ;;  %v1114_v17 = vmul.f32 0.003921569, %v873_v9  ;;  %v398_v19 = vunpack.c.1.s8 %v187_v2  ;;  %v399_v23 = vunpack.c.2.s8 %v187_v2 }
  0xfe   : > { %v1115_v18 = vmul.f32 0.003921569, %v874_v10  ;;  %1352 = vst [vmem:[%s1766_s16 + $0x610] sm:$0xff] %v1112_v11  ;;  %v1116_v20 = vmul.f32 0.003921569, %v875_v12  ;;  %v637_v22 = vand.u32 255, %v397_v14  ;;  %v400_v25 = vunpack.c.3.s8 %v187_v2 }
  0xff   : > { %v1117_v21 = vmul.f32 0.003921569, %v876_v13  ;;  %1353 = vst [vmem:[%s1766_s16 + $0x618] sm:$0xff] %v1113_v16  ;;  %1354 = vst [vmem:[%s1766_s16 + $0x620] sm:$0xff] %v1114_v17  ;;  %v638_v24 = vand.u32 255, %v398_v19  ;;  %v401_v26 = vunpack.c.0.s8 %v188_v15  ;;  %v402_v27 = vunpack.c.1.s8 %v188_v15  ;;  %v192_v19 = vld [vmem:[%s1753_s29 + $0x1b8] sm:$0xff] }
 0x100   : > { %1355 = vst [vmem:[%s1766_s16 + $0x628] sm:$0xff] %v1115_v18  ;;  %1356 = vst [vmem:[%s1766_s16 + $0x630] sm:$0xff] %v1116_v20  ;;  %v877_v28 = vcvt.s32.f32 %v637_v22  ;;  %v639_v29 = vand.u32 255, %v399_v23  ;;  %v403_v30 = vunpack.c.2.s8 %v188_v15  ;;  %v404_v31 = vunpack.c.3.s8 %v188_v15 }
 0x101   : > { %1357 = vst [vmem:[%s1766_s16 + $0x638] sm:$0xff] %v1117_v21  ;;  %v878_v32 = vcvt.s32.f32 %v638_v24  ;;  %v640_v33 = vand.u32 255, %v400_v25  ;;  %v641_v34 = vand.u32 255, %v401_v26  ;;  %v642_v35 = vand.u32 255, %v402_v27 }
 0x102   : > { %v1118_v37 = vmul.f32 0.003921569, %v877_v28  ;;  %v879_v38 = vcvt.s32.f32 %v639_v29  ;;  %v643_v39 = vand.u32 255, %v403_v30  ;;  %v644_v40 = vand.u32 255, %v404_v31 }
 0x103   : > { %v1119_v41 = vmul.f32 0.003921569, %v878_v32  ;;  %v880_v42 = vcvt.s32.f32 %v640_v33  ;;  %v881_v43 = vcvt.s32.f32 %v641_v34  ;;  %v882_v44 = vcvt.s32.f32 %v642_v35 }
 0x104   : > { %1358 = vst [vmem:[%s1766_s16 + $0x640] sm:$0xff] %v1118_v37  ;;  %v1120_v45 = vmul.f32 0.003921569, %v879_v38  ;;  %v883_v46 = vcvt.s32.f32 %v643_v39  ;;  %v884_v47 = vcvt.s32.f32 %v644_v40  ;;  %v405_v48 = vunpack.c.0.s8 %v189_v36  ;;  %v193_v40 = vld [vmem:[%s1753_s29 + $0x1c0] sm:$0xff] }
 0x105   : > { %1359 = vst [vmem:[%s1766_s16 + $0x648] sm:$0xff] %v1119_v41  ;;  %v1121_v50 = vmul.f32 0.003921569, %v880_v42  ;;  %v1122_v51 = vmul.f32 0.003921569, %v881_v43  ;;  %v406_v53 = vunpack.c.1.s8 %v189_v36  ;;  %v407_v57 = vunpack.c.2.s8 %v189_v36 }
 0x106   : > { %v1123_v52 = vmul.f32 0.003921569, %v882_v44  ;;  %1360 = vst [vmem:[%s1766_s16 + $0x650] sm:$0xff] %v1120_v45  ;;  %v1124_v54 = vmul.f32 0.003921569, %v883_v46  ;;  %v645_v56 = vand.u32 255, %v405_v48  ;;  %v408_v59 = vunpack.c.3.s8 %v189_v36 }
 0x107   : > { %v1125_v55 = vmul.f32 0.003921569, %v884_v47  ;;  %1361 = vst [vmem:[%s1766_s16 + $0x658] sm:$0xff] %v1121_v50  ;;  %1362 = vst [vmem:[%s1766_s16 + $0x660] sm:$0xff] %v1122_v51  ;;  %v646_v58 = vand.u32 255, %v406_v53  ;;  %v409_v60 = vunpack.c.0.s8 %v190_v49  ;;  %v410_v61 = vunpack.c.1.s8 %v190_v49  ;;  %v194_v53 = vld [vmem:[%s1753_s29 + $0x1c8] sm:$0xff] }
 0x108   : > { %1363 = vst [vmem:[%s1766_s16 + $0x668] sm:$0xff] %v1123_v52  ;;  %1364 = vst [vmem:[%s1766_s16 + $0x670] sm:$0xff] %v1124_v54  ;;  %v885_v62 = vcvt.s32.f32 %v645_v56  ;;  %v647_v63 = vand.u32 255, %v407_v57  ;;  %v411_v0 = vunpack.c.2.s8 %v190_v49  ;;  %v412_v1 = vunpack.c.3.s8 %v190_v49 }
 0x109   : > { %1365 = vst [vmem:[%s1766_s16 + $0x678] sm:$0xff] %v1125_v55  ;;  %v886_v2 = vcvt.s32.f32 %v646_v58  ;;  %v648_v3 = vand.u32 255, %v408_v59  ;;  %v649_v4 = vand.u32 255, %v409_v60  ;;  %v650_v5 = vand.u32 255, %v410_v61 }
 0x10a   : > { %v1126_v7 = vmul.f32 0.003921569, %v885_v62  ;;  %v887_v8 = vcvt.s32.f32 %v647_v63  ;;  %v651_v9 = vand.u32 255, %v411_v0  ;;  %v652_v10 = vand.u32 255, %v412_v1 }
 0x10b   : > { %v1127_v11 = vmul.f32 0.003921569, %v886_v2  ;;  %v888_v12 = vcvt.s32.f32 %v648_v3  ;;  %v889_v13 = vcvt.s32.f32 %v649_v4  ;;  %v890_v14 = vcvt.s32.f32 %v650_v5 }
 0x10c   : > { %1366 = vst [vmem:[%s1766_s16 + $0x680] sm:$0xff] %v1126_v7  ;;  %v1128_v15 = vmul.f32 0.003921569, %v887_v8  ;;  %v891_v16 = vcvt.s32.f32 %v651_v9  ;;  %v892_v17 = vcvt.s32.f32 %v652_v10  ;;  %v413_v18 = vunpack.c.0.s8 %v191_v6  ;;  %v195_v10 = vld [vmem:[%s1753_s29 + $0x1d0] sm:$0xff] }
 0x10d   : > { %1367 = vst [vmem:[%s1766_s16 + $0x688] sm:$0xff] %v1127_v11  ;;  %v1129_v20 = vmul.f32 0.003921569, %v888_v12  ;;  %v1130_v21 = vmul.f32 0.003921569, %v889_v13  ;;  %v414_v23 = vunpack.c.1.s8 %v191_v6  ;;  %v415_v27 = vunpack.c.2.s8 %v191_v6 }
 0x10e   : > { %v1131_v22 = vmul.f32 0.003921569, %v890_v14  ;;  %1368 = vst [vmem:[%s1766_s16 + $0x690] sm:$0xff] %v1128_v15  ;;  %v1132_v24 = vmul.f32 0.003921569, %v891_v16  ;;  %v653_v26 = vand.u32 255, %v413_v18  ;;  %v416_v29 = vunpack.c.3.s8 %v191_v6 }
 0x10f   : > { %v1133_v25 = vmul.f32 0.003921569, %v892_v17  ;;  %1369 = vst [vmem:[%s1766_s16 + $0x698] sm:$0xff] %v1129_v20  ;;  %1370 = vst [vmem:[%s1766_s16 + $0x6a0] sm:$0xff] %v1130_v21  ;;  %v654_v28 = vand.u32 255, %v414_v23  ;;  %v417_v30 = vunpack.c.0.s8 %v192_v19  ;;  %v418_v31 = vunpack.c.1.s8 %v192_v19  ;;  %v196_v23 = vld [vmem:[%s1753_s29 + $0x1d8] sm:$0xff] }
 0x110   : > { %1371 = vst [vmem:[%s1766_s16 + $0x6a8] sm:$0xff] %v1131_v22  ;;  %1372 = vst [vmem:[%s1766_s16 + $0x6b0] sm:$0xff] %v1132_v24  ;;  %v893_v32 = vcvt.s32.f32 %v653_v26  ;;  %v655_v33 = vand.u32 255, %v415_v27  ;;  %v419_v34 = vunpack.c.2.s8 %v192_v19  ;;  %v420_v35 = vunpack.c.3.s8 %v192_v19 }
 0x111   : > { %1373 = vst [vmem:[%s1766_s16 + $0x6b8] sm:$0xff] %v1133_v25  ;;  %v894_v36 = vcvt.s32.f32 %v654_v28  ;;  %v656_v37 = vand.u32 255, %v416_v29  ;;  %v657_v38 = vand.u32 255, %v417_v30  ;;  %v658_v39 = vand.u32 255, %v418_v31 }
 0x112   : > { %v1134_v41 = vmul.f32 0.003921569, %v893_v32  ;;  %v895_v42 = vcvt.s32.f32 %v655_v33  ;;  %v659_v43 = vand.u32 255, %v419_v34  ;;  %v660_v44 = vand.u32 255, %v420_v35 }
 0x113   : > { %v1135_v45 = vmul.f32 0.003921569, %v894_v36  ;;  %v896_v46 = vcvt.s32.f32 %v656_v37  ;;  %v897_v47 = vcvt.s32.f32 %v657_v38  ;;  %v898_v48 = vcvt.s32.f32 %v658_v39 }
 0x114   : > { %1374 = vst [vmem:[%s1766_s16 + $0x6c0] sm:$0xff] %v1134_v41  ;;  %v1136_v49 = vmul.f32 0.003921569, %v895_v42  ;;  %v899_v50 = vcvt.s32.f32 %v659_v43  ;;  %v900_v51 = vcvt.s32.f32 %v660_v44  ;;  %v421_v52 = vunpack.c.0.s8 %v193_v40 }
 0x115   : > { %1375 = vst [vmem:[%s1766_s16 + $0x6c8] sm:$0xff] %v1135_v45  ;;  %v1137_v54 = vmul.f32 0.003921569, %v896_v46  ;;  %v1138_v55 = vmul.f32 0.003921569, %v897_v47  ;;  %v422_v57 = vunpack.c.1.s8 %v193_v40  ;;  %v423_v61 = vunpack.c.2.s8 %v193_v40 }
 0x116   : > { %v1139_v56 = vmul.f32 0.003921569, %v898_v48  ;;  %1376 = vst [vmem:[%s1766_s16 + $0x6d0] sm:$0xff] %v1136_v49  ;;  %v1140_v58 = vmul.f32 0.003921569, %v899_v50  ;;  %v661_v60 = vand.u32 255, %v421_v52  ;;  %v424_v63 = vunpack.c.3.s8 %v193_v40 }
 0x117   : > { %v1141_v59 = vmul.f32 0.003921569, %v900_v51  ;;  %1377 = vst [vmem:[%s1766_s16 + $0x6d8] sm:$0xff] %v1137_v54  ;;  %1378 = vst [vmem:[%s1766_s16 + $0x6e0] sm:$0xff] %v1138_v55  ;;  %v662_v62 = vand.u32 255, %v422_v57  ;;  %v425_v0 = vunpack.c.0.s8 %v194_v53  ;;  %v426_v1 = vunpack.c.1.s8 %v194_v53 }
 0x118   : > { %1379 = vst [vmem:[%s1766_s16 + $0x6e8] sm:$0xff] %v1139_v56  ;;  %1380 = vst [vmem:[%s1766_s16 + $0x6f0] sm:$0xff] %v1140_v58  ;;  %v901_v2 = vcvt.s32.f32 %v661_v60  ;;  %v663_v3 = vand.u32 255, %v423_v61  ;;  %v427_v4 = vunpack.c.2.s8 %v194_v53  ;;  %v428_v5 = vunpack.c.3.s8 %v194_v53 }
 0x119   : > { %1381 = vst [vmem:[%s1766_s16 + $0x6f8] sm:$0xff] %v1141_v59  ;;  %v902_v6 = vcvt.s32.f32 %v662_v62  ;;  %v664_v7 = vand.u32 255, %v424_v63  ;;  %v665_v8 = vand.u32 255, %v425_v0  ;;  %v666_v9 = vand.u32 255, %v426_v1 }
 0x11a   : > { %v1142_v11 = vmul.f32 0.003921569, %v901_v2  ;;  %v903_v12 = vcvt.s32.f32 %v663_v3  ;;  %v667_v13 = vand.u32 255, %v427_v4  ;;  %v668_v14 = vand.u32 255, %v428_v5 }
 0x11b   : > { %v1143_v15 = vmul.f32 0.003921569, %v902_v6  ;;  %v904_v16 = vcvt.s32.f32 %v664_v7  ;;  %v905_v17 = vcvt.s32.f32 %v665_v8  ;;  %v906_v18 = vcvt.s32.f32 %v666_v9 }
 0x11c   : > { %1382 = vst [vmem:[%s1766_s16 + $0x700] sm:$0xff] %v1142_v11  ;;  %v1144_v19 = vmul.f32 0.003921569, %v903_v12  ;;  %v907_v20 = vcvt.s32.f32 %v667_v13  ;;  %v908_v21 = vcvt.s32.f32 %v668_v14  ;;  %v429_v22 = vunpack.c.0.s8 %v195_v10 }
 0x11d   : > { %1383 = vst [vmem:[%s1766_s16 + $0x708] sm:$0xff] %v1143_v15  ;;  %v1145_v24 = vmul.f32 0.003921569, %v904_v16  ;;  %v1146_v25 = vmul.f32 0.003921569, %v905_v17  ;;  %v430_v27 = vunpack.c.1.s8 %v195_v10  ;;  %v431_v31 = vunpack.c.2.s8 %v195_v10 }
 0x11e   : > { %v1147_v26 = vmul.f32 0.003921569, %v906_v18  ;;  %1384 = vst [vmem:[%s1766_s16 + $0x710] sm:$0xff] %v1144_v19  ;;  %v1148_v28 = vmul.f32 0.003921569, %v907_v20  ;;  %v669_v30 = vand.u32 255, %v429_v22  ;;  %v432_v33 = vunpack.c.3.s8 %v195_v10 }
 0x11f   : > { %v1149_v29 = vmul.f32 0.003921569, %v908_v21  ;;  %1385 = vst [vmem:[%s1766_s16 + $0x718] sm:$0xff] %v1145_v24  ;;  %1386 = vst [vmem:[%s1766_s16 + $0x720] sm:$0xff] %v1146_v25  ;;  %v670_v32 = vand.u32 255, %v430_v27  ;;  %v433_v34 = vunpack.c.0.s8 %v196_v23  ;;  %v434_v35 = vunpack.c.1.s8 %v196_v23 }
 0x120   : > { %1387 = vst [vmem:[%s1766_s16 + $0x728] sm:$0xff] %v1147_v26  ;;  %1388 = vst [vmem:[%s1766_s16 + $0x730] sm:$0xff] %v1148_v28  ;;  %v909_v36 = vcvt.s32.f32 %v669_v30  ;;  %v671_v37 = vand.u32 255, %v431_v31  ;;  %v435_v38 = vunpack.c.2.s8 %v196_v23  ;;  %v436_v39 = vunpack.c.3.s8 %v196_v23 }
 0x121   : > { %1389 = vst [vmem:[%s1766_s16 + $0x738] sm:$0xff] %v1149_v29  ;;  %v910_v40 = vcvt.s32.f32 %v670_v32  ;;  %v672_v41 = vand.u32 255, %v432_v33  ;;  %v673_v42 = vand.u32 255, %v433_v34  ;;  %v674_v43 = vand.u32 255, %v434_v35 }
 0x122   : > { %v1150_v44 = vmul.f32 0.003921569, %v909_v36  ;;  %v911_v45 = vcvt.s32.f32 %v671_v37  ;;  %v675_v46 = vand.u32 255, %v435_v38  ;;  %v676_v47 = vand.u32 255, %v436_v39 }
 0x123   : > { %v1151_v48 = vmul.f32 0.003921569, %v910_v40  ;;  %v912_v49 = vcvt.s32.f32 %v672_v41  ;;  %v913_v50 = vcvt.s32.f32 %v673_v42  ;;  %v914_v51 = vcvt.s32.f32 %v674_v43 }
 0x124   : > { %1390 = vst [vmem:[%s1766_s16 + $0x740] sm:$0xff] %v1150_v44  ;;  %v1152_v52 = vmul.f32 0.003921569, %v911_v45  ;;  %v915_v53 = vcvt.s32.f32 %v675_v46  ;;  %v916_v54 = vcvt.s32.f32 %v676_v47 }
 0x125   : > { %1391 = vst [vmem:[%s1766_s16 + $0x748] sm:$0xff] %v1151_v48  ;;  %v1153_v55 = vmul.f32 0.003921569, %v912_v49  ;;  %v1154_v56 = vmul.f32 0.003921569, %v913_v50 }
 0x126   : > { %v1155_v57 = vmul.f32 0.003921569, %v914_v51  ;;  %1392 = vst [vmem:[%s1766_s16 + $0x750] sm:$0xff] %v1152_v52  ;;  %v1156_v58 = vmul.f32 0.003921569, %v915_v53 }
 0x127   : > { %v1157_v59 = vmul.f32 0.003921569, %v916_v54  ;;  %1393 = vst [vmem:[%s1766_s16 + $0x758] sm:$0xff] %v1153_v55  ;;  %1394 = vst [vmem:[%s1766_s16 + $0x760] sm:$0xff] %v1154_v56 }
 0x128   : > { %1395 = vst [vmem:[%s1766_s16 + $0x768] sm:$0xff] %v1155_v57  ;;  %1396 = vst [vmem:[%s1766_s16 + $0x770] sm:$0xff] %v1156_v58 }
 0x129   : > { %1397 = vst [vmem:[%s1766_s16 + $0x778] sm:$0xff] %v1157_v59 }
 0x12a   : > { %1589 = shalt.err (!%p1586_p10)
}
 0x12b   : > { %s1590_s13 = scalar_lea.hbm %s2063_s30, 30720  ;;  %s1594_s20 = scalar_lea.hbm %s2115_s1, 61440 }
 0x12c   : > { %p1591_p0 = scmp.ne.s32.totalorder %s2063_s30, %s1590_s13  ;;  %p1595_p1 = scmp.lt.s32.totalorder %s2063_s30, %s2115_s1 }
 0x12d   : > { %p1596_p3 = scmp.lt.s32.totalorder %s1594_s20, %s1590_s13 }
 0x12e   : > { %p1592_p2 = pnand %p1591_p0, %p2123_p12 }
 0x12f   : > { %p1597_p6 = por %p1596_p3, %p1595_p1 }
 0x130   : > { %p1593_p9 = pneg %p1592_p2 }
 0x132   : > { %p1598_p11 = pnand %p1597_p6, %p1593_p9 }
 0x134   : > { %1601 = shalt.err (!%p1598_p11)
}
 0x135   : > { %s1646_s26 = smov 128   ;;  %s1647_s29 = smov 8  }
 0x136   : > { %1500 = dma.vmem_to_hbm [thread:$0]  (%p2123_p12), %s2065_s27, 30720, %s2063_s30, %s1399_s2, %s1646_s26, %s1646_s26, %s1647_s29  }
 0x137 PF: > { %s1427_s24 = sand.u32 1, %s1628_s6   ;;  %p2124_p13 = scmp.ne.s32.totalorder %s2120_s18, 0 }
 0x138   : > { %p2125_p4 = scmp.ge.s32.totalorder %s1640_s9, 2  ;;  %s1428_s16 = scalar_lea.sflag [#allocation4], %s1427_s24 }
 0x13a   : > { %p1507_p5 = pnand %p2125_p4, %p2124_p13 }
 0x13c   : > { %p1508_p7 = pneg %p1507_p5 }
 0x13e   : > { %1623 = dma.done.wait (%p1508_p7), %s1428_s16, 30720  }
 0x13f   : > { %1625 = vsyncadd (%p1508_p7), %s1428_s16, 4294936576  ;;  %p14_p8 = scmp.ge.s32.totalorder %s1683_s12, 4   ;;  %s2126_s6 = smov %s1632_s7 }
 0x140   : > { %s2127_s7 = smov %s1636_s8  ;;  %s2128_s8 = smov %s1695_s15 }
 0x141   : > { %s2129_s9 = smov %s1683_s12  ;;  %16 = sbr.rel (!%p14_p8) target bundleno = 5 (0x5), region = 69 }
 0x146   :  { %1433 = vsyncpa [#allocation3], 1 }
 0x147   :  { %1435 = vsyncpa [#allocation3 + $0x1], 1 }
 0x148   :  { %1436 = vsyncpa [#allocation4], 1 }
 0x149   :  { %1438 = vsyncpa [#allocation4 + $0x1], 1 }

</bundles_post_ra>
